<compile_context>
chip_gen: v7x
topology: tpu7x:2x2x1
jax: 0.10.0
libtpu: 0.0.40
codegen_flags: <defaults>
</compile_context>

<pallas_src>
import math
from functools import partial

import numpy as np
import jax
import jax.numpy as jnp
from jax import lax
from jax.experimental import pallas as pl
from jax.experimental.pallas import tpu as pltpu

NEG_INF = -1e30


def _longformer_flash_kernel(kv_idx_ref, kv_cnt_ref,          # scalar prefetch (SMEM)
                             q_ref, k_ref, v_ref,              # VMEM inputs
                             o_ref,                            # VMEM output
                             m_sc, l_sc, acc_sc,               # VMEM scratch
                             *, scale, hb, block_q, block_kv,
                             window_size, global_positions, num_kv_max):
    # q_ref: (hb, block_q, D); k_ref/v_ref: (hb, block_kv, D)
    # o_ref: (1, block_q, hb*D); scratch: m/l (hb, block_q, 1), acc (hb, block_q, D)
    qi = pl.program_id(1)
    kj = pl.program_id(2)

    @pl.when(kj == 0)
    def _init():
        m_sc[...] = jnp.full_like(m_sc, NEG_INF)
        l_sc[...] = jnp.zeros_like(l_sc)
        acc_sc[...] = jnp.zeros_like(acc_sc)

    # Skip padded (inactive) kv steps entirely: no MXU / EUP work, and the
    # padded index_map repeats the previous block index so no DMA happens.
    @pl.when(kj < kv_cnt_ref[qi])
    def _compute():
        kv_blk = kv_idx_ref[qi * num_kv_max + kj]

        # Rebuild the Longformer mask for this (q-tile, kv-tile) on the VPU
        # (cheap filler; removes the O(N^2) HBM/VMEM bias of the dense kernel).
        q_ids = qi * block_q + lax.broadcasted_iota(
            jnp.int32, (block_q, block_kv), 0)
        k_ids = kv_blk * block_kv + lax.broadcasted_iota(
            jnp.int32, (block_q, block_kv), 1)
        allowed = jnp.abs(q_ids - k_ids) <= window_size
        for g in global_positions:                      # small static set
            allowed = allowed | (q_ids == g) | (k_ids == g)
        bias = jnp.where(allowed, 0.0, NEG_INF).astype(jnp.float32)

        for h in range(hb):                             # hb <= 2: bounded live ranges
            q = q_ref[h]
            k = k_ref[h]
            v = v_ref[h]

            # NT matmul (contraction on D) - no explicit k.T through the XLU.
            s = lax.dot_general(q, k, (((1,), (1,)), ((), ())),
                                preferred_element_type=jnp.float32)
            s = s * scale + bias                        # f32 scale: no input rounding

            m_prev = m_sc[h]
            m_new = jnp.maximum(m_prev, jnp.max(s, axis=-1, keepdims=True))
            alpha = jnp.exp(m_prev - m_new)
            p = jnp.exp(s - m_new)

            l_sc[h] = alpha * l_sc[h] + jnp.sum(p, axis=-1, keepdims=True)
            acc_sc[h] = alpha * acc_sc[h] + lax.dot_general(
                p.astype(v.dtype), v, (((1,), (0,)), ((), ())),
                preferred_element_type=jnp.float32)
            m_sc[h] = m_new

    @pl.when(kj == pl.num_programs(2) - 1)
    def _finalize():
        # Deferred, exact normalization on the small (block_q, D) tiles;
        # pack hb heads side by side for a lane-dense (>=128) store.
        outs = [(acc_sc[h] / l_sc[h]).astype(o_ref.dtype) for h in range(hb)]
        o_ref[0] = outs[0] if hb == 1 else jnp.concatenate(outs, axis=-1)


def _build_block_tables(N, block_q, block_kv, window_size, global_positions):
    """Static (host-side) block-sparsity tables: which kv tiles each q tile visits."""
    nq_t = N // block_q
    nk_t = N // block_kv
    active = np.zeros((nq_t, nk_t), dtype=bool)
    for qi in range(nq_t):
        q_lo, q_hi = qi * block_q, (qi + 1) * block_q - 1
        q_glob = any(q_lo <= g <= q_hi for g in global_positions)
        for ki in range(nk_t):
            k_lo, k_hi = ki * block_kv, (ki + 1) * block_kv - 1
            band = (k_lo <= q_hi + window_size) and (k_hi >= q_lo - window_size)
            k_glob = any(k_lo <= g <= k_hi for g in global_positions)
            active[qi, ki] = band or q_glob or k_glob
    counts = active.sum(axis=1).astype(np.int32)        # >= 1 (diagonal always active)
    mkv = int(counts.max())
    kv_idx = np.zeros((nq_t, mkv), dtype=np.int32)
    for qi in range(nq_t):
        idxs = np.nonzero(active[qi])[0]
        kv_idx[qi, :len(idxs)] = idxs
        kv_idx[qi, len(idxs):] = idxs[-1]                # pad: repeat -> no extra DMA
    return kv_idx, counts, mkv, int(active.sum())


def longformer_attention(Q, K, V, *, window_size, global_positions=(),
                         block_q=None, block_kv=None, heads_per_block=None):
    """Pallas TPU implementation of LongformerAttention.forward.

    Q, K, V: [B, H, N, D]. Returns [B, H, N, D].
    """
    B, H, N, D = Q.shape
    BH = B * H
    scale = 1.0 / math.sqrt(D)                 # flex_attention default scaling
    global_positions = tuple(sorted({int(g) for g in global_positions}))

    if block_q is None:
        block_q = min(256, N)
    if block_kv is None:
        block_kv = min(256, N)
    assert N % block_q == 0 and N % block_kv == 0
    assert block_q % 8 == 0 and block_kv % 8 == 0

    # Heads per grid step: just enough to make the packed output lane-dense
    # (hb*D % 128 == 0); kept small so the tiling fits v7x's 64 MiB VMEM.
    if heads_per_block is None:
        hb = 1
        if D < 128 and 128 % D == 0 and BH % (128 // D) == 0:
            hb = 128 // D
    else:
        hb = heads_per_block
        assert BH % hb == 0
    G = BH // hb

    nq_t = N // block_q
    kv_idx, counts, mkv, n_active = _build_block_tables(
        N, block_q, block_kv, window_size, global_positions)
    kv_idx_flat = jnp.asarray(kv_idx.reshape(-1), dtype=jnp.int32)
    kv_cnt = jnp.asarray(counts, dtype=jnp.int32)

    Qf = Q.reshape(BH, N, D)
    Kf = K.reshape(BH, N, D)
    Vf = V.reshape(BH, N, D)

    kernel = partial(_longformer_flash_kernel, scale=scale, hb=hb,
                     block_q=block_q, block_kv=block_kv,
                     window_size=window_size, global_positions=global_positions,
                     num_kv_max=mkv)

    itemsize = jnp.dtype(Q.dtype).itemsize
    # Advisory cost: only the active (block-sparse) tile work.
    cost = pl.CostEstimate(
        flops=4 * BH * n_active * block_q * block_kv * D,
        transcendentals=BH * n_active * block_q * block_kv,
        bytes_accessed=(2 * BH * N * D * itemsize                       # Q, O
                        + 2 * BH * n_active * block_kv * D * itemsize), # K, V per active tile
    )

    # VMEM budget from the actual block footprint (double-buffered inputs/outputs,
    # scratch, a few f32 (block_q, block_kv) temporaries), with headroom; capped
    # below v7x's 64 MiB physical VMEM.
    q_blk = hb * block_q * D * itemsize
    kv_blk = hb * block_kv * D * itemsize
    o_blk = block_q * hb * D * itemsize
    scratch_b = hb * block_q * (D + 2) * 4
    work_b = 6 * block_q * block_kv * 4
    est = 2 * (q_blk + 2 * kv_blk) + 2 * o_blk + scratch_b + work_b
    vmem_limit = int(min(max(4 * est, 32 * 1024 * 1024), 56 * 1024 * 1024))

    out_packed = pl.pallas_call(
        kernel,
        out_shape=jax.ShapeDtypeStruct((G, N, hb * D), Q.dtype),
        grid_spec=pltpu.PrefetchScalarGridSpec(
            num_scalar_prefetch=2,
            grid=(G, nq_t, mkv),
            in_specs=[
                pl.BlockSpec((hb, block_q, D),
                             lambda g, qi, kj, kv_i, kv_c: (g, qi, 0)),
                pl.BlockSpec((hb, block_kv, D),
                             lambda g, qi, kj, kv_i, kv_c: (g, kv_i[qi * mkv + kj], 0)),
                pl.BlockSpec((hb, block_kv, D),
                             lambda g, qi, kj, kv_i, kv_c: (g, kv_i[qi * mkv + kj], 0)),
            ],
            out_specs=pl.BlockSpec((1, block_q, hb * D),
                                   lambda g, qi, kj, kv_i, kv_c: (g, qi, 0)),
            scratch_shapes=[
                pltpu.VMEM((hb, block_q, 1), jnp.float32),   # running max
                pltpu.VMEM((hb, block_q, 1), jnp.float32),   # running denom
                pltpu.VMEM((hb, block_q, D), jnp.float32),   # un-normalized acc
            ],
        ),
        compiler_params=pltpu.CompilerParams(
            dimension_semantics=("parallel", "parallel", "arbitrary"),
            vmem_limit_bytes=vmem_limit,
        ),
        cost_estimate=cost,
    )(kv_idx_flat, kv_cnt, Qf, Kf, Vf)

    # Un-pack the lane-dense output back to [B, H, N, D] (layout plumbing only).
    out = (out_packed.reshape(G, N, hb, D)
           .transpose(0, 2, 1, 3)
           .reshape(B, H, N, D))
    return out


def _reference(Q, K, V, *, window_size, global_positions=()):
    B, H, N, D = Q.shape
    scale = 1.0 / math.sqrt(D)
    qi = np.arange(N)[:, None]
    ki = np.arange(N)[None, :]
    glob = np.zeros((N,), dtype=bool)
    for g in global_positions:
        glob[g] = True
    mask = jnp.asarray((np.abs(qi - ki) <= window_size)
                       | glob[:, None] | glob[None, :])
    # HIGHEST precision so the reference itself is not the source of error
    # (the default f32 einsum on TPU uses reduced-precision passes).
    s = jnp.einsum("bhnd,bhmd->bhnm", Q, K,
                   precision=lax.Precision.HIGHEST).astype(jnp.float32) * scale
    s = jnp.where(mask[None, None], s, NEG_INF)
    p = jax.nn.softmax(s, axis=-1)
    out = jnp.einsum("bhnm,bhmd->bhnd", p, V.astype(jnp.float32),
                     precision=lax.Precision.HIGHEST)
    return out.astype(Q.dtype)


if __name__ == "__main__":
    # Small but non-trivial shape: 4 q-tiles x 4 kv-tiles so the block-sparse
    # skip / padding path is actually exercised (counts = [4, 3, 4, 3]).
    B, H, N, D = 2, 2, 256, 64
    window_size = 16
    global_positions = (0, 5, 130)

    key = jax.random.PRNGKey(0)
    kq, kk, kv = jax.random.split(key, 3)
    Q = jax.random.normal(kq, (B, H, N, D), dtype=jnp.float32)
    K = jax.random.normal(kk, (B, H, N, D), dtype=jnp.float32)
    V = jax.random.normal(kv, (B, H, N, D), dtype=jnp.float32)

    out = longformer_attention(Q, K, V, window_size=window_size,
                               global_positions=global_positions,
                               block_q=64, block_kv=64)
    out = jax.block_until_ready(out)

    ref = _reference(Q, K, V, window_size=window_size,
                     global_positions=global_positions)
    assert out.shape == (B, H, N, D)
    # Typical max-abs error is <=1e-5 (both sides f32); the tolerance leaves
    # headroom for reduced-precision f32 MXU passes on real hardware.
    err = float(jnp.max(jnp.abs(out - ref)))
    assert jnp.allclose(out, ref, atol=1e-2, rtol=1e-2), err
    print("KERNEL_OK")
</pallas_src>

<mosaic_0001>
module attributes {stable_mosaic.version = 11 : i64} {
  func.func @_longformer_flash_kernel(%arg0: i32, %arg1: i32, %arg2: i32, %arg3: memref<16xi32, #tpu.memory_space<smem>>, %arg4: memref<4xi32, #tpu.memory_space<smem>>, %arg5: memref<2x64x64xf32, #tpu.memory_space<vmem>>, %arg6: memref<2x64x64xf32, #tpu.memory_space<vmem>>, %arg7: memref<2x64x64xf32, #tpu.memory_space<vmem>>, %arg8: memref<1x64x128xf32, #tpu.memory_space<vmem>>, %arg9: memref<2x64x1xf32, #tpu.memory_space<vmem>>, %arg10: memref<2x64x1xf32, #tpu.memory_space<vmem>>, %arg11: memref<2x64x64xf32, #tpu.memory_space<vmem>>) attributes {dimension_semantics = [#tpu.dimension_semantics<parallel>, #tpu.dimension_semantics<parallel>, #tpu.dimension_semantics<arbitrary>], iteration_bounds = array<i64: 2, 4, 4>, scalar_prefetch = 2 : i64, scratch_operands = 3 : i64, tpu.core_type = #tpu.core_type<tc>, window_params = [{transform_indices = @transform_0, window_bounds = array<i64: 2, 64, 64>}, {transform_indices = @transform_1, window_bounds = array<i64: 2, 64, 64>}, {transform_indices = @transform_2, window_bounds = array<i64: 2, 64, 64>}, {transform_indices = @transform_3, window_bounds = array<i64: 1, 64, 128>}]} {
    %c0_i32 = arith.constant 0 : i32
    %0 = arith.cmpi eq, %arg2, %c0_i32 : i32
    %1 = arith.extui %0 : i1 to i32
    %c0_i32_0 = arith.constant 0 : i32
    %2 = arith.cmpi ne, %1, %c0_i32_0 : i32
    scf.if %2 {
      %cst = arith.constant -1.000000e+30 : f32
      %11 = vector.broadcast %cst : f32 to vector<2x64x1xf32>
      %c0 = arith.constant 0 : index
      %c0_3 = arith.constant 0 : index
      %c0_4 = arith.constant 0 : index
      %12 = vector.load %arg9[%c0, %c0_3, %c0_4] : memref<2x64x1xf32, #tpu.memory_space<vmem>>, vector<2x64x1xf32>
      tpu.vector_store %arg9[%c0, %c0_3, %c0_4], %11 {strides = array<i32>} : memref<2x64x1xf32, #tpu.memory_space<vmem>>, vector<2x64x1xf32>,
      %cst_5 = arith.constant 0.000000e+00 : f32
      %13 = vector.broadcast %cst_5 : f32 to vector<2x64x1xf32>
      %c0_6 = arith.constant 0 : index
      %c0_7 = arith.constant 0 : index
      %c0_8 = arith.constant 0 : index
      %14 = vector.load %arg10[%c0_6, %c0_7, %c0_8] : memref<2x64x1xf32, #tpu.memory_space<vmem>>, vector<2x64x1xf32>
      tpu.vector_store %arg10[%c0_6, %c0_7, %c0_8], %13 {strides = array<i32>} : memref<2x64x1xf32, #tpu.memory_space<vmem>>, vector<2x64x1xf32>,
      %cst_9 = arith.constant 0.000000e+00 : f32
      %15 = vector.broadcast %cst_9 : f32 to vector<2x64x64xf32>
      %c0_10 = arith.constant 0 : index
      %c0_11 = arith.constant 0 : index
      %c0_12 = arith.constant 0 : index
      %16 = vector.load %arg11[%c0_10, %c0_11, %c0_12] : memref<2x64x64xf32, #tpu.memory_space<vmem>>, vector<2x64x64xf32>
      tpu.vector_store %arg11[%c0_10, %c0_11, %c0_12], %15 {strides = array<i32>} : memref<2x64x64xf32, #tpu.memory_space<vmem>>, vector<2x64x64xf32>,
    } else {
    }
    %3 = arith.index_cast %arg1 : i32 to index
    %4 = memref.load %arg4[%3] : memref<4xi32, #tpu.memory_space<smem>>
    %5 = arith.cmpi slt, %arg2, %4 : i32
    %6 = arith.extui %5 : i1 to i32
    %c0_i32_1 = arith.constant 0 : i32
    %7 = arith.cmpi ne, %6, %c0_i32_1 : i32
    scf.if %7 {
      %c4_i32 = arith.constant 4 : i32
      %11 = arith.muli %arg1, %c4_i32 : i32
      %12 = arith.addi %11, %arg2 : i32
      %13 = arith.index_cast %12 : i32 to index
      %14 = memref.load %arg3[%13] : memref<16xi32, #tpu.memory_space<smem>>
      %c64_i32 = arith.constant 64 : i32
      %15 = arith.muli %arg1, %c64_i32 : i32
      %16 = tpu.iota {dimensions = array<i32: 0>} : vector<64x64xi32>
      %17 = vector.broadcast %15 : i32 to vector<64x64xi32>
      %18 = arith.addi %17, %16 : vector<64x64xi32>
      %c64_i32_3 = arith.constant 64 : i32
      %19 = arith.muli %14, %c64_i32_3 : i32
      %20 = tpu.iota {dimensions = array<i32: 1>} : vector<64x64xi32>
      %21 = vector.broadcast %19 : i32 to vector<64x64xi32>
      %22 = arith.addi %21, %20 : vector<64x64xi32>
      %23 = arith.subi %18, %22 : vector<64x64xi32>
      %24 = math.absi %23 : vector<64x64xi32>
      %c16_i32 = arith.constant 16 : i32
      %25 = vector.broadcast %c16_i32 : i32 to vector<64x64xi32>
      %26 = arith.cmpi sle, %24, %25 : vector<64x64xi32>
      %c0_i32_4 = arith.constant 0 : i32
      %27 = vector.broadcast %c0_i32_4 : i32 to vector<64x64xi32>
      %28 = arith.cmpi eq, %18, %27 : vector<64x64xi32>
      %29 = arith.ori %26, %28 : vector<64x64xi1>
      %c0_i32_5 = arith.constant 0 : i32
      %30 = vector.broadcast %c0_i32_5 : i32 to vector<64x64xi32>
      %31 = arith.cmpi eq, %22, %30 : vector<64x64xi32>
      %32 = arith.ori %29, %31 : vector<64x64xi1>
      %c5_i32 = arith.constant 5 : i32
      %33 = vector.broadcast %c5_i32 : i32 to vector<64x64xi32>
      %34 = arith.cmpi eq, %18, %33 : vector<64x64xi32>
      %35 = arith.ori %32, %34 : vector<64x64xi1>
      %c5_i32_6 = arith.constant 5 : i32
      %36 = vector.broadcast %c5_i32_6 : i32 to vector<64x64xi32>
      %37 = arith.cmpi eq, %22, %36 : vector<64x64xi32>
      %38 = arith.ori %35, %37 : vector<64x64xi1>
      %c130_i32 = arith.constant 130 : i32
      %39 = vector.broadcast %c130_i32 : i32 to vector<64x64xi32>
      %40 = arith.cmpi eq, %18, %39 : vector<64x64xi32>
      %41 = arith.ori %38, %40 : vector<64x64xi1>
      %c130_i32_7 = arith.constant 130 : i32
      %42 = vector.broadcast %c130_i32_7 : i32 to vector<64x64xi32>
      %43 = arith.cmpi eq, %22, %42 : vector<64x64xi32>
      %44 = arith.ori %41, %43 : vector<64x64xi1>
      %cst = arith.constant 0.000000e+00 : f32
      %cst_8 = arith.constant -1.000000e+30 : f32
      %45 = vector.broadcast %cst : f32 to vector<64x64xf32>
      %46 = vector.broadcast %cst_8 : f32 to vector<64x64xf32>
      %47 = arith.select %44, %45, %46 : vector<64x64xi1>, vector<64x64xf32>
      %c0 = arith.constant 0 : index
      %c0_9 = arith.constant 0 : index
      %c0_10 = arith.constant 0 : index
      %48 = vector.load %arg5[%c0, %c0_9, %c0_10] : memref<2x64x64xf32, #tpu.memory_space<vmem>>, vector<1x64x64xf32>
      %49 = vector.shape_cast %48 : vector<1x64x64xf32> to vector<64x64xf32>
      %c0_11 = arith.constant 0 : index
      %c0_12 = arith.constant 0 : index
      %c0_13 = arith.constant 0 : index
      %50 = vector.load %arg6[%c0_11, %c0_12, %c0_13] : memref<2x64x64xf32, #tpu.memory_space<vmem>>, vector<1x64x64xf32>
      %51 = vector.shape_cast %50 : vector<1x64x64xf32> to vector<64x64xf32>
      %c0_14 = arith.constant 0 : index
      %c0_15 = arith.constant 0 : index
      %c0_16 = arith.constant 0 : index
      %52 = vector.load %arg7[%c0_14, %c0_15, %c0_16] : memref<2x64x64xf32, #tpu.memory_space<vmem>>, vector<1x64x64xf32>
      %53 = vector.shape_cast %52 : vector<1x64x64xf32> to vector<64x64xf32>
      %cst_17 = arith.constant dense<0.000000e+00> : vector<64x64xf32>
      %54 = tpu.matmul %49, %51, %cst_17 {dimension_numbers = #tpu.dot_dimension_numbers<[1], [1], [0], [0], [0, 0, 1, 0], [], []>} : vector<64x64xf32>, vector<64x64xf32>, vector<64x64xf32> -> vector<64x64xf32>
      %cst_18 = arith.constant 1.250000e-01 : f32
      %55 = vector.broadcast %cst_18 : f32 to vector<64x64xf32>
      %56 = arith.mulf %54, %55 : vector<64x64xf32>
      %57 = arith.addf %56, %47 : vector<64x64xf32>
      %c0_19 = arith.constant 0 : index
      %c0_20 = arith.constant 0 : index
      %c0_21 = arith.constant 0 : index
      %58 = vector.load %arg9[%c0_19, %c0_20, %c0_21] : memref<2x64x1xf32, #tpu.memory_space<vmem>>, vector<1x64x1xf32>
      %59 = vector.shape_cast %58 : vector<1x64x1xf32> to vector<64x1xf32>
      %cst_22 = arith.constant dense<0xFF800000> : vector<64xf32>
      %60 = vector.multi_reduction <maximumf>, %57, %cst_22 [1] : vector<64x64xf32> to vector<64xf32>
      %61 = vector.shape_cast %60 : vector<64xf32> to vector<64x1xf32>
      %62 = arith.maximumf %59, %61 : vector<64x1xf32>
      %63 = arith.subf %59, %62 : vector<64x1xf32>
      %64 = math.exp %63 : vector<64x1xf32>
      %65 = vector.broadcast %62 : vector<64x1xf32> to vector<64x64xf32>
      %66 = arith.subf %57, %65 : vector<64x64xf32>
      %67 = math.exp %66 : vector<64x64xf32>
      %c0_23 = arith.constant 0 : index
      %c0_24 = arith.constant 0 : index
      %c0_25 = arith.constant 0 : index
      %68 = vector.load %arg10[%c0_23, %c0_24, %c0_25] : memref<2x64x1xf32, #tpu.memory_space<vmem>>, vector<1x64x1xf32>
      %69 = vector.shape_cast %68 : vector<1x64x1xf32> to vector<64x1xf32>
      %70 = arith.mulf %64, %69 : vector<64x1xf32>
      %cst_26 = arith.constant dense<0.000000e+00> : vector<64xf32>
      %71 = vector.multi_reduction <add>, %67, %cst_26 [1] : vector<64x64xf32> to vector<64xf32>
      %72 = vector.shape_cast %71 : vector<64xf32> to vector<64x1xf32>
      %73 = arith.addf %70, %72 : vector<64x1xf32>
      %c0_27 = arith.constant 0 : index
      %c0_28 = arith.constant 0 : index
      %c0_29 = arith.constant 0 : index
      %74 = vector.load %arg10[%c0_27, %c0_28, %c0_29] : memref<2x64x1xf32, #tpu.memory_space<vmem>>, vector<1x64x1xf32>
      %75 = vector.shape_cast %74 : vector<1x64x1xf32> to vector<64x1xf32>
      %76 = vector.shape_cast %73 : vector<64x1xf32> to vector<1x64x1xf32>
      tpu.vector_store %arg10[%c0_27, %c0_28, %c0_29], %76 {strides = array<i32>} : memref<2x64x1xf32, #tpu.memory_space<vmem>>, vector<1x64x1xf32>,
      %c0_30 = arith.constant 0 : index
      %c0_31 = arith.constant 0 : index
      %c0_32 = arith.constant 0 : index
      %77 = vector.load %arg11[%c0_30, %c0_31, %c0_32] : memref<2x64x64xf32, #tpu.memory_space<vmem>>, vector<1x64x64xf32>
      %78 = vector.shape_cast %77 : vector<1x64x64xf32> to vector<64x64xf32>
      %79 = vector.broadcast %64 : vector<64x1xf32> to vector<64x64xf32>
      %80 = arith.mulf %79, %78 : vector<64x64xf32>
      %cst_33 = arith.constant dense<0.000000e+00> : vector<64x64xf32>
      %81 = tpu.matmul %67, %53, %cst_33 {dimension_numbers = #tpu.dot_dimension_numbers<[1], [0], [0], [1], [0, 0, 1, 1], [], []>} : vector<64x64xf32>, vector<64x64xf32>, vector<64x64xf32> -> vector<64x64xf32>
      %82 = arith.addf %80, %81 : vector<64x64xf32>
      %c0_34 = arith.constant 0 : index
      %c0_35 = arith.constant 0 : index
      %c0_36 = arith.constant 0 : index
      %83 = vector.load %arg11[%c0_34, %c0_35, %c0_36] : memref<2x64x64xf32, #tpu.memory_space<vmem>>, vector<1x64x64xf32>
      %84 = vector.shape_cast %83 : vector<1x64x64xf32> to vector<64x64xf32>
      %85 = vector.shape_cast %82 : vector<64x64xf32> to vector<1x64x64xf32>
      tpu.vector_store %arg11[%c0_34, %c0_35, %c0_36], %85 {strides = array<i32>} : memref<2x64x64xf32, #tpu.memory_space<vmem>>, vector<1x64x64xf32>,
      %c0_37 = arith.constant 0 : index
      %c0_38 = arith.constant 0 : index
      %c0_39 = arith.constant 0 : index
      %86 = vector.load %arg9[%c0_37, %c0_38, %c0_39] : memref<2x64x1xf32, #tpu.memory_space<vmem>>, vector<1x64x1xf32>
      %87 = vector.shape_cast %86 : vector<1x64x1xf32> to vector<64x1xf32>
      %88 = vector.shape_cast %62 : vector<64x1xf32> to vector<1x64x1xf32>
      tpu.vector_store %arg9[%c0_37, %c0_38, %c0_39], %88 {strides = array<i32>} : memref<2x64x1xf32, #tpu.memory_space<vmem>>, vector<1x64x1xf32>,
      %c1 = arith.constant 1 : index
      %c0_40 = arith.constant 0 : index
      %c0_41 = arith.constant 0 : index
      %89 = vector.load %arg5[%c1, %c0_40, %c0_41] : memref<2x64x64xf32, #tpu.memory_space<vmem>>, vector<1x64x64xf32>
      %90 = vector.shape_cast %89 : vector<1x64x64xf32> to vector<64x64xf32>
      %c1_42 = arith.constant 1 : index
      %c0_43 = arith.constant 0 : index
      %c0_44 = arith.constant 0 : index
      %91 = vector.load %arg6[%c1_42, %c0_43, %c0_44] : memref<2x64x64xf32, #tpu.memory_space<vmem>>, vector<1x64x64xf32>
      %92 = vector.shape_cast %91 : vector<1x64x64xf32> to vector<64x64xf32>
      %c1_45 = arith.constant 1 : index
      %c0_46 = arith.constant 0 : index
      %c0_47 = arith.constant 0 : index
      %93 = vector.load %arg7[%c1_45, %c0_46, %c0_47] : memref<2x64x64xf32, #tpu.memory_space<vmem>>, vector<1x64x64xf32>
      %94 = vector.shape_cast %93 : vector<1x64x64xf32> to vector<64x64xf32>
      %cst_48 = arith.constant dense<0.000000e+00> : vector<64x64xf32>
      %95 = tpu.matmul %90, %92, %cst_48 {dimension_numbers = #tpu.dot_dimension_numbers<[1], [1], [0], [0], [0, 0, 1, 0], [], []>} : vector<64x64xf32>, vector<64x64xf32>, vector<64x64xf32> -> vector<64x64xf32>
      %cst_49 = arith.constant 1.250000e-01 : f32
      %96 = vector.broadcast %cst_49 : f32 to vector<64x64xf32>
      %97 = arith.mulf %95, %96 : vector<64x64xf32>
      %98 = arith.addf %97, %47 : vector<64x64xf32>
      %c1_50 = arith.constant 1 : index
      %c0_51 = arith.constant 0 : index
      %c0_52 = arith.constant 0 : index
      %99 = vector.load %arg9[%c1_50, %c0_51, %c0_52] : memref<2x64x1xf32, #tpu.memory_space<vmem>>, vector<1x64x1xf32>
      %100 = vector.shape_cast %99 : vector<1x64x1xf32> to vector<64x1xf32>
      %cst_53 = arith.constant dense<0xFF800000> : vector<64xf32>
      %101 = vector.multi_reduction <maximumf>, %98, %cst_53 [1] : vector<64x64xf32> to vector<64xf32>
      %102 = vector.shape_cast %101 : vector<64xf32> to vector<64x1xf32>
      %103 = arith.maximumf %100, %102 : vector<64x1xf32>
      %104 = arith.subf %100, %103 : vector<64x1xf32>
      %105 = math.exp %104 : vector<64x1xf32>
      %106 = vector.broadcast %103 : vector<64x1xf32> to vector<64x64xf32>
      %107 = arith.subf %98, %106 : vector<64x64xf32>
      %108 = math.exp %107 : vector<64x64xf32>
      %c1_54 = arith.constant 1 : index
      %c0_55 = arith.constant 0 : index
      %c0_56 = arith.constant 0 : index
      %109 = vector.load %arg10[%c1_54, %c0_55, %c0_56] : memref<2x64x1xf32, #tpu.memory_space<vmem>>, vector<1x64x1xf32>
      %110 = vector.shape_cast %109 : vector<1x64x1xf32> to vector<64x1xf32>
      %111 = arith.mulf %105, %110 : vector<64x1xf32>
      %cst_57 = arith.constant dense<0.000000e+00> : vector<64xf32>
      %112 = vector.multi_reduction <add>, %108, %cst_57 [1] : vector<64x64xf32> to vector<64xf32>
      %113 = vector.shape_cast %112 : vector<64xf32> to vector<64x1xf32>
      %114 = arith.addf %111, %113 : vector<64x1xf32>
      %c1_58 = arith.constant 1 : index
      %c0_59 = arith.constant 0 : index
      %c0_60 = arith.constant 0 : index
      %115 = vector.load %arg10[%c1_58, %c0_59, %c0_60] : memref<2x64x1xf32, #tpu.memory_space<vmem>>, vector<1x64x1xf32>
      %116 = vector.shape_cast %115 : vector<1x64x1xf32> to vector<64x1xf32>
      %117 = vector.shape_cast %114 : vector<64x1xf32> to vector<1x64x1xf32>
      tpu.vector_store %arg10[%c1_58, %c0_59, %c0_60], %117 {strides = array<i32>} : memref<2x64x1xf32, #tpu.memory_space<vmem>>, vector<1x64x1xf32>,
      %c1_61 = arith.constant 1 : index
      %c0_62 = arith.constant 0 : index
      %c0_63 = arith.constant 0 : index
      %118 = vector.load %arg11[%c1_61, %c0_62, %c0_63] : memref<2x64x64xf32, #tpu.memory_space<vmem>>, vector<1x64x64xf32>
      %119 = vector.shape_cast %118 : vector<1x64x64xf32> to vector<64x64xf32>
      %120 = vector.broadcast %105 : vector<64x1xf32> to vector<64x64xf32>
      %121 = arith.mulf %120, %119 : vector<64x64xf32>
      %cst_64 = arith.constant dense<0.000000e+00> : vector<64x64xf32>
      %122 = tpu.matmul %108, %94, %cst_64 {dimension_numbers = #tpu.dot_dimension_numbers<[1], [0], [0], [1], [0, 0, 1, 1], [], []>} : vector<64x64xf32>, vector<64x64xf32>, vector<64x64xf32> -> vector<64x64xf32>
      %123 = arith.addf %121, %122 : vector<64x64xf32>
      %c1_65 = arith.constant 1 : index
      %c0_66 = arith.constant 0 : index
      %c0_67 = arith.constant 0 : index
      %124 = vector.load %arg11[%c1_65, %c0_66, %c0_67] : memref<2x64x64xf32, #tpu.memory_space<vmem>>, vector<1x64x64xf32>
      %125 = vector.shape_cast %124 : vector<1x64x64xf32> to vector<64x64xf32>
      %126 = vector.shape_cast %123 : vector<64x64xf32> to vector<1x64x64xf32>
      tpu.vector_store %arg11[%c1_65, %c0_66, %c0_67], %126 {strides = array<i32>} : memref<2x64x64xf32, #tpu.memory_space<vmem>>, vector<1x64x64xf32>,
      %c1_68 = arith.constant 1 : index
      %c0_69 = arith.constant 0 : index
      %c0_70 = arith.constant 0 : index
      %127 = vector.load %arg9[%c1_68, %c0_69, %c0_70] : memref<2x64x1xf32, #tpu.memory_space<vmem>>, vector<1x64x1xf32>
      %128 = vector.shape_cast %127 : vector<1x64x1xf32> to vector<64x1xf32>
      %129 = vector.shape_cast %103 : vector<64x1xf32> to vector<1x64x1xf32>
      tpu.vector_store %arg9[%c1_68, %c0_69, %c0_70], %129 {strides = array<i32>} : memref<2x64x1xf32, #tpu.memory_space<vmem>>, vector<1x64x1xf32>,
    } else {
    }
    %c3_i32 = arith.constant 3 : i32
    %8 = arith.cmpi eq, %arg2, %c3_i32 : i32
    %9 = arith.extui %8 : i1 to i32
    %c0_i32_2 = arith.constant 0 : i32
    %10 = arith.cmpi ne, %9, %c0_i32_2 : i32
    scf.if %10 {
      %c0 = arith.constant 0 : index
      %c0_3 = arith.constant 0 : index
      %c0_4 = arith.constant 0 : index
      %11 = vector.load %arg11[%c0, %c0_3, %c0_4] : memref<2x64x64xf32, #tpu.memory_space<vmem>>, vector<1x64x64xf32>
      %12 = vector.shape_cast %11 : vector<1x64x64xf32> to vector<64x64xf32>
      %c0_5 = arith.constant 0 : index
      %c0_6 = arith.constant 0 : index
      %c0_7 = arith.constant 0 : index
      %13 = vector.load %arg10[%c0_5, %c0_6, %c0_7] : memref<2x64x1xf32, #tpu.memory_space<vmem>>, vector<1x64x1xf32>
      %14 = vector.shape_cast %13 : vector<1x64x1xf32> to vector<64x1xf32>
      %15 = vector.broadcast %14 : vector<64x1xf32> to vector<64x64xf32>
      %16 = arith.divf %12, %15 : vector<64x64xf32>
      %c1 = arith.constant 1 : index
      %c0_8 = arith.constant 0 : index
      %c0_9 = arith.constant 0 : index
      %17 = vector.load %arg11[%c1, %c0_8, %c0_9] : memref<2x64x64xf32, #tpu.memory_space<vmem>>, vector<1x64x64xf32>
      %18 = vector.shape_cast %17 : vector<1x64x64xf32> to vector<64x64xf32>
      %c1_10 = arith.constant 1 : index
      %c0_11 = arith.constant 0 : index
      %c0_12 = arith.constant 0 : index
      %19 = vector.load %arg10[%c1_10, %c0_11, %c0_12] : memref<2x64x1xf32, #tpu.memory_space<vmem>>, vector<1x64x1xf32>
      %20 = vector.shape_cast %19 : vector<1x64x1xf32> to vector<64x1xf32>
      %21 = vector.broadcast %20 : vector<64x1xf32> to vector<64x64xf32>
      %22 = arith.divf %18, %21 : vector<64x64xf32>
      %23 = tpu.concatenate %16, %22 in 1 : vector<64x64xf32>, vector<64x64xf32> -> vector<64x128xf32>
      %c0_13 = arith.constant 0 : index
      %c0_14 = arith.constant 0 : index
      %c0_15 = arith.constant 0 : index
      %24 = vector.load %arg8[%c0_13, %c0_14, %c0_15] : memref<1x64x128xf32, #tpu.memory_space<vmem>>, vector<1x64x128xf32>
      %25 = vector.shape_cast %24 : vector<1x64x128xf32> to vector<64x128xf32>
      %26 = vector.shape_cast %23 : vector<64x128xf32> to vector<1x64x128xf32>
      tpu.vector_store %arg8[%c0_13, %c0_14, %c0_15], %26 {strides = array<i32>} : memref<1x64x128xf32, #tpu.memory_space<vmem>>, vector<1x64x128xf32>,
    } else {
    }
    return
  }
  func.func @transform_0(%arg0: i32, %arg1: i32, %arg2: i32, %arg3: memref<16xi32, #tpu.memory_space<smem>>, %arg4: memref<4xi32, #tpu.memory_space<smem>>) -> (i32, i32, i32) {
    %c0_i32 = arith.constant 0 : i32
    %c0_i32_0 = arith.constant 0 : i32
    return %arg0, %arg1, %c0_i32 : i32, i32, i32
  }
  func.func @transform_1(%arg0: i32, %arg1: i32, %arg2: i32, %arg3: memref<16xi32, #tpu.memory_space<smem>>, %arg4: memref<4xi32, #tpu.memory_space<smem>>) -> (i32, i32, i32) {
    %c4_i32 = arith.constant 4 : i32
    %0 = arith.muli %arg1, %c4_i32 : i32
    %1 = arith.addi %0, %arg2 : i32
    %2 = arith.index_cast %1 : i32 to index
    %3 = memref.load %arg3[%2] : memref<16xi32, #tpu.memory_space<smem>>
    %c0_i32 = arith.constant 0 : i32
    %c0_i32_0 = arith.constant 0 : i32
    return %arg0, %3, %c0_i32 : i32, i32, i32
  }
  func.func @transform_2(%arg0: i32, %arg1: i32, %arg2: i32, %arg3: memref<16xi32, #tpu.memory_space<smem>>, %arg4: memref<4xi32, #tpu.memory_space<smem>>) -> (i32, i32, i32) {
    %c4_i32 = arith.constant 4 : i32
    %0 = arith.muli %arg1, %c4_i32 : i32
    %1 = arith.addi %0, %arg2 : i32
    %2 = arith.index_cast %1 : i32 to index
    %3 = memref.load %arg3[%2] : memref<16xi32, #tpu.memory_space<smem>>
    %c0_i32 = arith.constant 0 : i32
    %c0_i32_0 = arith.constant 0 : i32
    return %arg0, %3, %c0_i32 : i32, i32, i32
  }
  func.func @transform_3(%arg0: i32, %arg1: i32, %arg2: i32, %arg3: memref<16xi32, #tpu.memory_space<smem>>, %arg4: memref<4xi32, #tpu.memory_space<smem>>) -> (i32, i32, i32) {
    %c0_i32 = arith.constant 0 : i32
    %c0_i32_0 = arith.constant 0 : i32
    return %arg0, %arg1, %c0_i32 : i32, i32, i32
  }
}

</mosaic_0001>

<bundles_post_ra>
// kernel: tpu_custom_call.1
= control target key start
LH: loop header
LB: loop body
LE: loop exit
PB: predicated region body
PF: predicated region fallthrough
CT: control target
= control target key end

     0   :  { %s4301_s0 = inlined_call_operand.vmem [shape: s32[16], index: 0, kind: input, shape index: {}]   ;;  %s4302_s2 = inlined_call_operand.vmem [shape: f32[4,256,64], index: 2, kind: input, shape index: {}]   ;;  %s4303_s3 = inlined_call_operand.vmem [shape: f32[4,256,64], index: 3, kind: input, shape index: {}]   ;;  %s4304_s4 = inlined_call_operand.vmem [shape: f32[4,256,64], index: 4, kind: input, shape index: {}]   ;;  %s4305_s5 = inlined_call_operand.hbm [shape: f32[2,256,128], index: 5, kind: output, shape index: {}]   ;;  %s4306_s1 = inlined_call_operand.vmem [shape: s32[4], index: 1, kind: input, shape index: {}]  }
   0x1   :  { %4319 = sst [smem:[#allocation23_spill]] %s4304_s4  ;;  %s10_s20 = sshll.u32 %s4301_s0, 4  ;;  %s11_s20 = int_to_ptr.vmem [resolvable:$true] %s10_s20 }
   0x2   :  { %4320 = sst [smem:[#allocation24_spill]] %s4305_s5  ;;  %s14_s23 = sshll.u32 %s4306_s1, 4  ;;  %s15_s23 = int_to_ptr.vmem [resolvable:$true] %s14_s23 }
   0x3   :  { %s2920_s24 = scalar_lea.vmem %s11_s20, 16  ;;  %p2925_p1 = scmp.lt.s32.totalorder %s11_s20, %s11_s20 }
   0x4   :  { %p2921_p0 = scmp.ne.s32.totalorder %s11_s20, %s2920_s24  ;;  %p2926_p2 = scmp.lt.s32.totalorder %s2920_s24, %s2920_s24 }
   0x6   :  { %p2927_p3 = por %p2926_p2, %p2925_p1 }
   0x8   :  { %p2928_p4 = pnand %p2927_p3, %p2921_p0 }
   0xa   :  { %2931 = shalt.err (!%p2928_p4)  }
   0xb   :  { %s3090_s25 = smov [#allocation6]   ;;  %s2932_s26 = scalar_lea.vmem %s15_s23, 16 }
   0xc   :  { %13 = dma.vmem_to_smem %s11_s20, 16, %s3090_s25, [#allocation5] }
   0xd   :  { %p2933_p5 = scmp.ne.s32.totalorder %s15_s23, %s2932_s26  ;;  %p2937_p6 = scmp.lt.s32.totalorder %s15_s23, %s15_s23 }
   0xe   :  { %p2938_p7 = scmp.lt.s32.totalorder %s2932_s26, %s2932_s26 }
  0x10   :  { %p2939_p8 = por %p2938_p7, %p2937_p6 }
  0x12   :  { %p2940_p9 = pnand %p2939_p8, %p2933_p5 }
  0x14   :  { %2943 = shalt.err (!%p2940_p9)  }
  0x15   :  { %s3091_s0 = smov [#allocation7]  }
  0x16   :  { %17 = dma.vmem_to_smem %s15_s23, 16, %s3091_s0, [#allocation5] }
  0x17   :  { %3028 = dma.done.wait [#allocation5], 32 }
  0x18   :  { %3029 = vsyncadd [#allocation5], 4294967264 }
  0x19   :  { %19 = sfence }
  0x1a   :  { %20 = vsyncpa [#allocation12], 0 }
  0x1b   :  { %22 = vsyncpa [#allocation12 + $0x1], 0  ;;  %s3137_s1 = smov 0   ;;  %s3139_s27 = smov 0  }
  0x1c   :  { %s3141_s28 = smov 0   ;;  %s3143_s29 = smov 0  }
  0x1d   :  { %s3145_s30 = smov 0   ;;  %s3147_s6 = smov 0  }
  0x1e   :  { %s3149_s7 = smov 0   ;;  %s3151_s8 = smov 0  }
  0x1f   :  { %s3153_s9 = smov 0   ;;  %s3155_s10 = smov 0  }
  0x20   :  { %s3157_s11 = smov 0   ;;  %s3159_s12 = smov 0  }
  0x21   :  { %s3161_s13 = smov 0   ;;  %s3163_s14 = smov 0  }
  0x22 LB: > { %4321 = sst [smem:[#allocation15_spill]] %s3048_s29  ;;  %s40_s17 = sadd.s32 1, %s3076_s11  ;;  %s3088_s14 = sphi %s3163_s14, %s28_s14   ;;  %s3084_s13 = sphi %s3161_s13, %s4479_s13   ;;  %s3080_s12 = sphi %s3159_s12, %s4478_s12   ;;  %s3076_s11 = sphi %s3157_s11, %s4466_s11   ;;  %s3072_s10 = sphi %s3155_s10, %s4477_s10   ;;  %s3068_s9 = sphi %s3153_s9, %s4476_s9   ;;  %s3064_s8 = sphi %s3151_s8, %s4465_s8   ;;  %s3060_s7 = sphi %s3149_s7, %s4475_s7   ;;  %s3056_s6 = sphi %s3147_s6, %s4474_s6   ;;  %s3052_s30 = sphi %s3145_s30, %s4473_s30   ;;  %s3048_s29 = sphi %s3143_s29, %s4472_s29   ;;  %s3044_s28 = sphi %s3141_s28, %s4471_s28   ;;  %s3040_s27 = sphi %s3139_s27, %s4470_s27   ;;  %s3036_s1 = sphi %s3137_s1, %s4469_s1  }
  0x23   : > { %4322 = sst [smem:[#allocation16_spill]] %s3064_s8  ;;  %s43_s18 = sadd.s32 1, %s3080_s12 }
  0x24   : > { %4323 = sst [smem:[#allocation17_spill]] %s3068_s9  ;;  %p41_p10 = scmp.ge.s32.totalorder %s40_s17, 4 }
  0x25   : > { %4324 = sst [smem:[#allocation18_spill]] %s3072_s10  ;;  %s47_s19 = sadd.s32 1, %s3084_s13 }
  0x26   : > { %4325 = sst [smem:[#allocation19_spill]] %s3076_s11  ;;  %p63_p11 = scmp.ne.s32.totalorder %s3060_s7, %s3056_s6 }
  0x27   : > { %s4481_s17 = smov (%p41_p10, %s40_s17), 0  ;;  %s4483_s18 = smov (!%p41_p10, %s43_s18), %s3080_s12 }
  0x28   : > { %4326 = sst [smem:[#allocation20_spill]] %s4481_s17  ;;  %p64_p12 = scmp.eq.s32.totalorder %s3088_s14, 0 }
  0x29   : > { %s2312_s21 = sshll.u32 %s3080_s12, 2  ;;  %p45_p13 = scmp.ge.s32.totalorder %s4483_s18, 4 }
  0x2a   : > { %s3221_s22 = sadd.s32 %s3076_s11, %s2312_s21  ;;  %p3228_p0 = por %p64_p12, %p63_p11 }
  0x2b   : > { %s81_s24 = sld [smem:[#allocation6 + %s3221_s22]]  ;;  %s4485_s18 = smov (%p45_p13, %s4483_s18), 0 }
  0x2c   : > { %4328 = sst [smem:[#allocation21_spill]] %s4485_s18  ;;  %s4487_s19 = smov (!%p45_p13, %s47_s19), %s3084_s13 }
  0x2d   : > { %s52_s25 = ssub.s32 %s3080_s12, %s4485_s18  ;;  %s2313_s26 = sshll.u32 %s4485_s18, 2 }
  0x2e   : > { %p49_p1 = scmp.ge.s32.totalorder %s4487_s19, 2  ;;  %s83_s0 = sadd.s32 %s2313_s26, %s4481_s17 }
  0x2f   : > { %s84_s21 = sld [smem:[#allocation6 + %s83_s0]]  ;;  %s90_s16 = sadd.s32 1, %s3052_s30 }
  0x30   : > { %s4489_s19 = smov (%p49_p1, %s4487_s19), 0  ;;  %p97_p2 = scmp.ne.s32.totalorder %s3052_s30, %s3048_s29 }
  0x31   : > { %4329 = sst [smem:[#allocation22_spill]] %s4489_s19  ;;  %s51_s20 = ssub.s32 %s3084_s13, %s4489_s19 }
  0x32   : > { %s115_s15 = sld [smem:[#allocation6 + %s3221_s22]]  ;;  %s53_s5 = sor.u32 %s52_s25, %s51_s20 }
  0x33   : > { %s118_s11 = sld [smem:[#allocation6 + %s83_s0]]  ;;  %p3250_p3 = por %p97_p2, %p64_p12 }
  0x34   : > { %p54_p4 = scmp.eq.s32.totalorder %s53_s5, 0  ;;  %s124_s18 = sadd.s32 1, %s3044_s28 }
  0x35   : > { %s86_s17 = ssub.s32 %s81_s24, %s84_s21  ;;  %p131_p5 = scmp.ne.s32.totalorder %s3044_s28, %s3040_s27 }
  0x36   : > { %s4331_s10 = sadd.s32 1, %s3060_s7  ;;  %s87_s0 = sor.u32 %s86_s17, %s51_s20 }
  0x37   : > { %s3260_s9 = scalar_select %p54_p4, %s3060_s7, %s4331_s10  }
  0x38   : > { %p3264_p6 = por %p131_p5, %p64_p12  ;;  %p88_p7 = scmp.eq.s32.totalorder %s87_s0, 0 }
  0x39   : > { %s120_s19 = ssub.s32 %s115_s15, %s118_s11  ;;  %s4333_s29 = sadd.s32 4294967295, %s3088_s14  }
  0x3a   : > { %s121_s8 = sor.u32 %s120_s19, %s51_s20  ;;  %p163_p8 = scmp.eq.s32.totalorder %s4333_s29, 31 }
  0x3b   : > { %s3271_s4 = scalar_select %p88_p7, %s3052_s30, %s90_s16  }
  0x3c   : > { %p122_p9 = scmp.eq.s32.totalorder %s121_s8, 0  ;;  %p3276_p10 = por %p163_p8, %p63_p11 }
  0x3d   : > { %p168_p13 = scmp.ne.s32.totalorder %s3056_s6, %s3036_s1  ;;  %s4335_s10 = sadd.s32 4294967294, %s3088_s14  }
  0x3e   : > { %p169_p1 = scmp.eq.s32.totalorder %s4335_s10, 31  ;;  %p2317_p2 = scmp.ge.s32.totalorder %s3088_s14, 32 }
  0x3f   : > { %s3285_s17 = scalar_select %p122_p9, %s3044_s28, %s124_s18  }
  0x40   : > { %p3287_p12 = por %p169_p1, %p168_p13  ;;  %185 = sbr.rel (%p2317_p2) target bundleno = 124 (0x7c), region = 16 }
  0x47   : > { %188 = sbr.rel (!%p3228_p0) target bundleno = 86 (0x56), region = 20  ;;  %s190_s29 = sand.u32 (%p3228_p0), 1, %s3060_s7  }
  0x48   : > { %s2320_s8 = sshll.u32 (%p3228_p0), %s3080_s12, 3  ;;  %s2318_s11 = sshll.u32 (%p3228_p0), %s190_s29, 7 }
  0x49   : > { %s2432_s15 = sshll.u32 (%p3228_p0), %s3084_s13, 6  ;;  %s192_s23 = scalar_lea.vmem (%p3228_p0), [#allocation8], %s2318_s11 }
  0x4a   : > { %s196_s16 = sadd.s32 (%p3228_p0), %s2432_s15, %s2320_s8 }
  0x4b   : > { %s2322_s18 = sshll.u32 (%p3228_p0), %s196_s16, 3 }
  0x4c   : > { %s3300_s21 = scalar_lea.vmem (%p3228_p0), %s4302_s2, %s2322_s18 }
  0x4d   : > { %v256_v0 = vld [vmem:[%s3300_s21] sm:$0xff] (%p3228_p0)  ;;  %v258_v1 = vld [vmem:[%s3300_s21 + $0x8] sm:$0xff] (%p3228_p0)  ;;  %v260_v2 = vld [vmem:[%s3300_s21 + $0x10] sm:$0xff] (%p3228_p0) }
  0x4e   : > { %257 = vst [vmem:[%s192_s23] sm:$0xff] %v256_v0  ;;  %259 = vst [vmem:[%s192_s23 + $0x8] sm:$0xff] %v258_v1  ;;  %v262_v3 = vld [vmem:[%s3300_s21 + $0x18] sm:$0xff]  ;;  %v264_v4 = vld [vmem:[%s3300_s21 + $0x20] sm:$0xff] }
  0x4f   : > { %261 = vst [vmem:[%s192_s23 + $0x10] sm:$0xff] %v260_v2  ;;  %v266_v5 = vld [vmem:[%s3300_s21 + $0x28] sm:$0xff]  ;;  %263 = vst [vmem:[%s192_s23 + $0x18] sm:$0xff] %v262_v3  ;;  %v268_v6 = vld [vmem:[%s3300_s21 + $0x30] sm:$0xff] }
  0x50   : > { %265 = vst [vmem:[%s192_s23 + $0x20] sm:$0xff] %v264_v4  ;;  %267 = vst [vmem:[%s192_s23 + $0x28] sm:$0xff] %v266_v5  ;;  %v270_v7 = vld [vmem:[%s3300_s21 + $0x38] sm:$0xff]  ;;  %v272_v8 = vld [vmem:[%s3300_s21 + $0x100] sm:$0xff] }
  0x51   : > { %269 = vst [vmem:[%s192_s23 + $0x30] sm:$0xff] %v268_v6  ;;  %271 = vst [vmem:[%s192_s23 + $0x38] sm:$0xff] %v270_v7  ;;  %v274_v9 = vld [vmem:[%s3300_s21 + $0x108] sm:$0xff]  ;;  %v276_v10 = vld [vmem:[%s3300_s21 + $0x110] sm:$0xff] }
  0x52   : > { %273 = vst [vmem:[%s192_s23 + $0x40] sm:$0xff] %v272_v8  ;;  %v278_v11 = vld [vmem:[%s3300_s21 + $0x118] sm:$0xff]  ;;  %275 = vst [vmem:[%s192_s23 + $0x48] sm:$0xff] %v274_v9  ;;  %v280_v12 = vld [vmem:[%s3300_s21 + $0x120] sm:$0xff] }
  0x53   : > { %277 = vst [vmem:[%s192_s23 + $0x50] sm:$0xff] %v276_v10  ;;  %279 = vst [vmem:[%s192_s23 + $0x58] sm:$0xff] %v278_v11  ;;  %v282_v13 = vld [vmem:[%s3300_s21 + $0x128] sm:$0xff]  ;;  %v284_v14 = vld [vmem:[%s3300_s21 + $0x130] sm:$0xff] }
  0x54   : > { %281 = vst [vmem:[%s192_s23 + $0x60] sm:$0xff] %v280_v12  ;;  %283 = vst [vmem:[%s192_s23 + $0x68] sm:$0xff] %v282_v13  ;;  %v286_v15 = vld [vmem:[%s3300_s21 + $0x138] sm:$0xff] }
  0x55   : > { %285 = vst [vmem:[%s192_s23 + $0x70] sm:$0xff] %v284_v14  ;;  %287 = vst [vmem:[%s192_s23 + $0x78] sm:$0xff] %v286_v15 }
  0x56 PF: > { %293 = sbr.rel (!%p3250_p3) target bundleno = 105 (0x69), region = 58  ;;  %s300_s0 = sld [smem:[#allocation6 + %s3221_s22]] (%p3250_p3) }
  0x57   : > { %s295_s10 = sand.u32 (%p3250_p3), 1, %s3052_s30   ;;  %s2433_s29 = sshll.u32 (%p3250_p3), %s3084_s13, 6 }
  0x58   : > { %s2323_s8 = sshll.u32 (%p3250_p3), %s295_s10, 7 }
  0x59   : > { %s297_s26 = scalar_lea.vmem (%p3250_p3), [#allocation9], %s2323_s8 }
  0x5c   : > { %s2326_s11 = sshll.u32 (%p3250_p3), %s300_s0, 3 }
  0x5d   : > { %s304_s15 = sadd.s32 %s2433_s29, %s2326_s11 }
  0x5e   : > { %s2328_s16 = sshll.u32 %s304_s15, 3 }
  0x5f   : > { %s3326_s20 = scalar_lea.vmem %s4303_s3, %s2328_s16 }
  0x60   : > { %v364_v16 = vld [vmem:[%s3326_s20] sm:$0xff]  ;;  %v366_v17 = vld [vmem:[%s3326_s20 + $0x8] sm:$0xff]  ;;  %v368_v18 = vld [vmem:[%s3326_s20 + $0x10] sm:$0xff] }
  0x61   : > { %365 = vst [vmem:[%s297_s26] sm:$0xff] %v364_v16  ;;  %367 = vst [vmem:[%s297_s26 + $0x8] sm:$0xff] %v366_v17  ;;  %v370_v19 = vld [vmem:[%s3326_s20 + $0x18] sm:$0xff]  ;;  %v372_v20 = vld [vmem:[%s3326_s20 + $0x20] sm:$0xff] }
  0x62   : > { %369 = vst [vmem:[%s297_s26 + $0x10] sm:$0xff] %v368_v18  ;;  %v374_v21 = vld [vmem:[%s3326_s20 + $0x28] sm:$0xff]  ;;  %371 = vst [vmem:[%s297_s26 + $0x18] sm:$0xff] %v370_v19  ;;  %v376_v22 = vld [vmem:[%s3326_s20 + $0x30] sm:$0xff] }
  0x63   : > { %373 = vst [vmem:[%s297_s26 + $0x20] sm:$0xff] %v372_v20  ;;  %375 = vst [vmem:[%s297_s26 + $0x28] sm:$0xff] %v374_v21  ;;  %v378_v23 = vld [vmem:[%s3326_s20 + $0x38] sm:$0xff]  ;;  %v380_v24 = vld [vmem:[%s3326_s20 + $0x100] sm:$0xff] }
  0x64   : > { %377 = vst [vmem:[%s297_s26 + $0x30] sm:$0xff] %v376_v22  ;;  %379 = vst [vmem:[%s297_s26 + $0x38] sm:$0xff] %v378_v23  ;;  %v382_v25 = vld [vmem:[%s3326_s20 + $0x108] sm:$0xff]  ;;  %v384_v26 = vld [vmem:[%s3326_s20 + $0x110] sm:$0xff] }
  0x65   : > { %381 = vst [vmem:[%s297_s26 + $0x40] sm:$0xff] %v380_v24  ;;  %v386_v27 = vld [vmem:[%s3326_s20 + $0x118] sm:$0xff]  ;;  %383 = vst [vmem:[%s297_s26 + $0x48] sm:$0xff] %v382_v25  ;;  %v388_v28 = vld [vmem:[%s3326_s20 + $0x120] sm:$0xff] }
  0x66   : > { %385 = vst [vmem:[%s297_s26 + $0x50] sm:$0xff] %v384_v26  ;;  %387 = vst [vmem:[%s297_s26 + $0x58] sm:$0xff] %v386_v27  ;;  %v390_v29 = vld [vmem:[%s3326_s20 + $0x128] sm:$0xff]  ;;  %v392_v30 = vld [vmem:[%s3326_s20 + $0x130] sm:$0xff] }
  0x67   : > { %389 = vst [vmem:[%s297_s26 + $0x60] sm:$0xff] %v388_v28  ;;  %391 = vst [vmem:[%s297_s26 + $0x68] sm:$0xff] %v390_v29  ;;  %v394_v31 = vld [vmem:[%s3326_s20 + $0x138] sm:$0xff] }
  0x68   : > { %393 = vst [vmem:[%s297_s26 + $0x70] sm:$0xff] %v392_v30  ;;  %395 = vst [vmem:[%s297_s26 + $0x78] sm:$0xff] %v394_v31 }
  0x69 PF: > { %401 = sbr.rel (!%p3264_p6) target bundleno = 124 (0x7c), region = 96  ;;  %s408_s21 = sld [smem:[#allocation6 + %s3221_s22]] (%p3264_p6) }
  0x6a   : > { %s403_s23 = sand.u32 (%p3264_p6), 1, %s3044_s28   ;;  %s2434_s0 = sshll.u32 (%p3264_p6), %s3084_s13, 6 }
  0x6b   : > { %s2329_s10 = sshll.u32 (%p3264_p6), %s403_s23, 7  ;;  %s4337_s18 = sld [smem:[#allocation23_spill]] (%p3264_p6) }
  0x6c   : > { %s405_s22 = scalar_lea.vmem (%p3264_p6), [#allocation10], %s2329_s10 }
  0x6f   : > { %s2332_s29 = sshll.u32 (%p3264_p6), %s408_s21, 3 }
  0x70   : > { %s412_s8 = sadd.s32 %s2434_s0, %s2332_s29 }
  0x71   : > { %s2334_s11 = sshll.u32 %s412_s8, 3 }
  0x72   : > { %s3352_s19 = scalar_lea.vmem %s4337_s18, %s2334_s11 }
  0x73   : > { %v472_v32 = vld [vmem:[%s3352_s19] sm:$0xff]  ;;  %v474_v33 = vld [vmem:[%s3352_s19 + $0x8] sm:$0xff]  ;;  %v476_v34 = vld [vmem:[%s3352_s19 + $0x10] sm:$0xff] }
  0x74   : > { %473 = vst [vmem:[%s405_s22] sm:$0xff] %v472_v32  ;;  %475 = vst [vmem:[%s405_s22 + $0x8] sm:$0xff] %v474_v33  ;;  %v478_v35 = vld [vmem:[%s3352_s19 + $0x18] sm:$0xff]  ;;  %v480_v36 = vld [vmem:[%s3352_s19 + $0x20] sm:$0xff] }
  0x75   : > { %477 = vst [vmem:[%s405_s22 + $0x10] sm:$0xff] %v476_v34  ;;  %v482_v37 = vld [vmem:[%s3352_s19 + $0x28] sm:$0xff]  ;;  %479 = vst [vmem:[%s405_s22 + $0x18] sm:$0xff] %v478_v35  ;;  %v484_v38 = vld [vmem:[%s3352_s19 + $0x30] sm:$0xff] }
  0x76   : > { %481 = vst [vmem:[%s405_s22 + $0x20] sm:$0xff] %v480_v36  ;;  %483 = vst [vmem:[%s405_s22 + $0x28] sm:$0xff] %v482_v37  ;;  %v486_v39 = vld [vmem:[%s3352_s19 + $0x38] sm:$0xff]  ;;  %v488_v40 = vld [vmem:[%s3352_s19 + $0x100] sm:$0xff] }
  0x77   : > { %485 = vst [vmem:[%s405_s22 + $0x30] sm:$0xff] %v484_v38  ;;  %487 = vst [vmem:[%s405_s22 + $0x38] sm:$0xff] %v486_v39  ;;  %v490_v41 = vld [vmem:[%s3352_s19 + $0x108] sm:$0xff]  ;;  %v492_v42 = vld [vmem:[%s3352_s19 + $0x110] sm:$0xff] }
  0x78   : > { %489 = vst [vmem:[%s405_s22 + $0x40] sm:$0xff] %v488_v40  ;;  %v494_v43 = vld [vmem:[%s3352_s19 + $0x118] sm:$0xff]  ;;  %491 = vst [vmem:[%s405_s22 + $0x48] sm:$0xff] %v490_v41  ;;  %v496_v44 = vld [vmem:[%s3352_s19 + $0x120] sm:$0xff] }
  0x79   : > { %493 = vst [vmem:[%s405_s22 + $0x50] sm:$0xff] %v492_v42  ;;  %495 = vst [vmem:[%s405_s22 + $0x58] sm:$0xff] %v494_v43  ;;  %v498_v45 = vld [vmem:[%s3352_s19 + $0x128] sm:$0xff]  ;;  %v500_v46 = vld [vmem:[%s3352_s19 + $0x130] sm:$0xff] }
  0x7a   : > { %497 = vst [vmem:[%s405_s22 + $0x60] sm:$0xff] %v496_v44  ;;  %499 = vst [vmem:[%s405_s22 + $0x68] sm:$0xff] %v498_v45  ;;  %v502_v47 = vld [vmem:[%s3352_s19 + $0x138] sm:$0xff] }
  0x7b   : > { %501 = vst [vmem:[%s405_s22 + $0x70] sm:$0xff] %v500_v46  ;;  %503 = vst [vmem:[%s405_s22 + $0x78] sm:$0xff] %v502_v47 }
  0x7c PF: > { %p2335_p11 = scmp.ge.s32.totalorder %s3088_s14, 1  ;;  %p508_p0 = scmp.lt.s32.totalorder %s3088_s14, 33 }
  0x7e   : > { %p509_p3 = pnand %p2335_p11, %p508_p0 }
  0x7f   : > { %s4338_s25 = sld [smem:[#allocation15_spill]] (!%p509_p3)  ;;  %s3373_s20 = sand.u32 (!%p509_p3), 1, %s3056_s6  }
  0x80   : > { %512 = sbr.rel (%p509_p3) target bundleno = 1799 (0x707), region = 134  ;;  %s2336_s21 = sshll.u32 (!%p509_p3), %s3373_s20, 7 }
  0x81   : > { %s529_s0 = sand.u32 (!%p509_p3), 1, %s3040_s27   ;;  %s2339_s10 = sshll.u32 (!%p509_p3), %s3373_s20, 6 }
  0x82   : > { %s2338_s29 = sshll.u32 (!%p509_p3), %s529_s0, 7  ;;  %s3379_s8 = scalar_lea.vmem (!%p509_p3), [#allocation8], %s2336_s21 }
  0x83   : > { %s3383_s15 = scalar_lea.vmem (!%p509_p3), [#allocation10], %s2338_s29  ;;  %s3385_s16 = scalar_lea.vmem (!%p509_p3), [#allocation11], %s2339_s10 }
  0x84   : > { %s4339_s18 = sld [smem:[#allocation16_spill]] (!%p509_p3) }
  0x85   : > { %s522_s26 = sand.u32 (!%p509_p3), 1, %s4338_s25  }
  0x86   : > { %s2337_s23 = sshll.u32 (!%p509_p3), %s522_s26, 7 }
  0x87   : > { %s3381_s11 = scalar_lea.vmem [#allocation9], %s2337_s23 }
  0x8a   : > { %p2340_p4 = scmp.ne.s32.totalorder %s4339_s18, 0 }
  0x8b   : > { %vm577_vm0 = vcmask (!%p2340_p4), 7168   ;;  %vm610_vm1 = vcmask (!%p2340_p4), 523264   ;;  %v3092_v48 = vmov (!%p2340_p4), -1e+30   ;;  %v3093_v49 = vmov (!%p2340_p4), 0.0  }
  0x8c   : > { %576 = sbr.rel (%p2340_p4) target bundleno = 164 (0xa4), region = 150  ;;  %578 = vst.msk [vmem:[#allocation2] sm:$0xff] (!%p2340_p4), %vm577_vm0, %v3092_v48  ;;  %579 = vst.msk [vmem:[#allocation2 + $0x8] sm:$0xff] (!%p2340_p4), %vm577_vm0, %v3092_v48 }
  0x8d   : > { %580 = vst.msk [vmem:[#allocation2 + $0x10] sm:$0xff] (!%p2340_p4), %vm577_vm0, %v3092_v48  ;;  %581 = vst.msk [vmem:[#allocation2 + $0x18] sm:$0xff] (!%p2340_p4), %vm577_vm0, %v3092_v48 }
  0x8e   : > { %582 = vst.msk [vmem:[#allocation2 + $0x20] sm:$0xff] (!%p2340_p4), %vm577_vm0, %v3092_v48  ;;  %583 = vst.msk [vmem:[#allocation2 + $0x28] sm:$0xff] (!%p2340_p4), %vm577_vm0, %v3092_v48 }
  0x8f   : > { %584 = vst.msk [vmem:[#allocation2 + $0x30] sm:$0xff] (!%p2340_p4), %vm577_vm0, %v3092_v48  ;;  %585 = vst.msk [vmem:[#allocation2 + $0x38] sm:$0xff] (!%p2340_p4), %vm577_vm0, %v3092_v48 }
  0x90   : > { %586 = vst.msk [vmem:[#allocation2 + $0x40] sm:$0xff] (!%p2340_p4), %vm577_vm0, %v3092_v48  ;;  %587 = vst.msk [vmem:[#allocation2 + $0x48] sm:$0xff] (!%p2340_p4), %vm577_vm0, %v3092_v48 }
  0x91   : > { %588 = vst.msk [vmem:[#allocation2 + $0x50] sm:$0xff] (!%p2340_p4), %vm577_vm0, %v3092_v48  ;;  %589 = vst.msk [vmem:[#allocation2 + $0x58] sm:$0xff] (!%p2340_p4), %vm577_vm0, %v3092_v48 }
  0x92   : > { %590 = vst.msk [vmem:[#allocation2 + $0x60] sm:$0xff] (!%p2340_p4), %vm577_vm0, %v3092_v48  ;;  %591 = vst.msk [vmem:[#allocation2 + $0x68] sm:$0xff] (!%p2340_p4), %vm577_vm0, %v3092_v48 }
  0x93   : > { %592 = vst.msk [vmem:[#allocation2 + $0x70] sm:$0xff] %vm577_vm0, %v3092_v48  ;;  %593 = vst.msk [vmem:[#allocation2 + $0x78] sm:$0xff] %vm577_vm0, %v3092_v48 }
  0x94   : > { %594 = vst.msk [vmem:[#allocation3] sm:$0xff] %vm577_vm0, %v3093_v49  ;;  %595 = vst.msk [vmem:[#allocation3 + $0x8] sm:$0xff] %vm577_vm0, %v3093_v49 }
  0x95   : > { %596 = vst.msk [vmem:[#allocation3 + $0x10] sm:$0xff] %vm577_vm0, %v3093_v49  ;;  %597 = vst.msk [vmem:[#allocation3 + $0x18] sm:$0xff] %vm577_vm0, %v3093_v49 }
  0x96   : > { %598 = vst.msk [vmem:[#allocation3 + $0x20] sm:$0xff] %vm577_vm0, %v3093_v49  ;;  %599 = vst.msk [vmem:[#allocation3 + $0x28] sm:$0xff] %vm577_vm0, %v3093_v49 }
  0x97   : > { %600 = vst.msk [vmem:[#allocation3 + $0x30] sm:$0xff] %vm577_vm0, %v3093_v49  ;;  %601 = vst.msk [vmem:[#allocation3 + $0x38] sm:$0xff] %vm577_vm0, %v3093_v49 }
  0x98   : > { %602 = vst.msk [vmem:[#allocation3 + $0x40] sm:$0xff] %vm577_vm0, %v3093_v49  ;;  %603 = vst.msk [vmem:[#allocation3 + $0x48] sm:$0xff] %vm577_vm0, %v3093_v49 }
  0x99   : > { %604 = vst.msk [vmem:[#allocation3 + $0x50] sm:$0xff] %vm577_vm0, %v3093_v49  ;;  %605 = vst.msk [vmem:[#allocation3 + $0x58] sm:$0xff] %vm577_vm0, %v3093_v49 }
  0x9a   : > { %606 = vst.msk [vmem:[#allocation3 + $0x60] sm:$0xff] %vm577_vm0, %v3093_v49  ;;  %607 = vst.msk [vmem:[#allocation3 + $0x68] sm:$0xff] %vm577_vm0, %v3093_v49 }
  0x9b   : > { %608 = vst.msk [vmem:[#allocation3 + $0x70] sm:$0xff] %vm577_vm0, %v3093_v49  ;;  %609 = vst.msk [vmem:[#allocation3 + $0x78] sm:$0xff] %vm577_vm0, %v3093_v49 }
  0x9c   : > { %611 = vst.msk [vmem:[#allocation4] sm:$0xff] %vm610_vm1, %v3093_v49  ;;  %612 = vst.msk [vmem:[#allocation4 + $0x8] sm:$0xff] %vm610_vm1, %v3093_v49 }
  0x9d   : > { %613 = vst.msk [vmem:[#allocation4 + $0x10] sm:$0xff] %vm610_vm1, %v3093_v49  ;;  %614 = vst.msk [vmem:[#allocation4 + $0x18] sm:$0xff] %vm610_vm1, %v3093_v49 }
  0x9e   : > { %615 = vst.msk [vmem:[#allocation4 + $0x20] sm:$0xff] %vm610_vm1, %v3093_v49  ;;  %616 = vst.msk [vmem:[#allocation4 + $0x28] sm:$0xff] %vm610_vm1, %v3093_v49 }
  0x9f   : > { %617 = vst.msk [vmem:[#allocation4 + $0x30] sm:$0xff] %vm610_vm1, %v3093_v49  ;;  %618 = vst.msk [vmem:[#allocation4 + $0x38] sm:$0xff] %vm610_vm1, %v3093_v49 }
  0xa0   : > { %619 = vst.msk [vmem:[#allocation4 + $0x40] sm:$0xff] %vm610_vm1, %v3093_v49  ;;  %620 = vst.msk [vmem:[#allocation4 + $0x48] sm:$0xff] %vm610_vm1, %v3093_v49 }
  0xa1   : > { %621 = vst.msk [vmem:[#allocation4 + $0x50] sm:$0xff] %vm610_vm1, %v3093_v49  ;;  %622 = vst.msk [vmem:[#allocation4 + $0x58] sm:$0xff] %vm610_vm1, %v3093_v49 }
  0xa2   : > { %623 = vst.msk [vmem:[#allocation4 + $0x60] sm:$0xff] %vm610_vm1, %v3093_v49  ;;  %624 = vst.msk [vmem:[#allocation4 + $0x68] sm:$0xff] %vm610_vm1, %v3093_v49 }
  0xa3   : > { %625 = vst.msk [vmem:[#allocation4 + $0x70] sm:$0xff] %vm610_vm1, %v3093_v49  ;;  %626 = vst.msk [vmem:[#allocation4 + $0x78] sm:$0xff] %vm610_vm1, %v3093_v49 }
  0xa4 PF: > { %s4340_s27 = sld [smem:[#allocation17_spill]]  ;;  %s4341_s22 = sld [smem:[#allocation16_spill]] }
  0xaa   : > { %s627_s19 = sld [smem:[#allocation7 + %s4340_s27]] }
  0xb0   : > { %p2341_p5 = scmp.ge.s32.totalorder %s4341_s22, %s627_s19 }
  0xb1   : > { %v790_v50 = vld [vmem:[%s3381_s11] sm:$0xff] (!%p2341_p5)  ;;  %v791_v51 = vld [vmem:[%s3381_s11 + $0x8] sm:$0xff] (!%p2341_p5)  ;;  %vm4314_vm2 = vcmask (!%p2341_p5), 523264   ;;  %v792_v52 = vld [vmem:[%s3381_s11 + $0x10] sm:$0xff] (!%p2341_p5)  ;;  %v4342_v54 = vmov (!%p2341_p5), 0  ;;  %s4344_s25 = sld [smem:[#allocation17_spill]] (!%p2341_p5)  ;;  %v636_v7 = vlaneseq (!%p2341_p5) }
  0xb2   : > { %631 = sbr.rel (%p2341_p5) target bundleno = 1487 (0x5cf), region = 154  ;;  %v2611_v53 = vpack.c.bf16 (!%p2341_p5), %v791_v51, %v790_v50  ;;  %vm3443_vm3 = vmpackc.low (!%p2341_p5), %vm4314_vm2, %vm4314_vm2  ;;  %v793_v55 = vld [vmem:[%s3381_s11 + $0x18] sm:$0xff] (!%p2341_p5)  ;;  %v782_v57 = vld [vmem:[%s3379_s8] sm:$0xff] (!%p2341_p5)  ;;  %s4345_s26 = sld [smem:[#allocation16_spill]] (!%p2341_p5)  ;;  %v4348_v45 = vmov (!%p2341_p5), 0  ;;  %v4350_v49 = vmov (!%p2341_p5), 0 }
  0xb3   : > { %v4343_v54 = vsel (!%p2341_p5), %vm3443_vm3, 4294967295, %v4342_v54  ;;  %v2617_v56 = vpack.c.bf16 (!%p2341_p5), %v793_v55, %v792_v52  ;;  %2515 = vmatprep.mubr.msk.f32.mxu0 (!%p2341_p5), %vm4314_vm2, %v782_v57  ;;  %v794_v58 = vld [vmem:[%s3381_s11 + $0x20] sm:$0xff] (!%p2341_p5)  ;;  %v795_v59 = vld [vmem:[%s3381_s11 + $0x28] sm:$0xff] (!%p2341_p5)  ;;  %v796_v61 = vld [vmem:[%s3381_s11 + $0x30] sm:$0xff] (!%p2341_p5)  ;;  %v637_v8 = vshrl.u32 (!%p2341_p5), %v636_v7, 7  ;;  %v656_v9 = vand.u32 (!%p2341_p5), 127, %v636_v7 }
  0xb4   : > { %2613 = vmatprep.subr.msk.bf16.mxu0 (!%p2341_p5), %vm3443_vm3, %v2611_v53  ;;  %v2623_v60 = vpack.c.bf16 (!%p2341_p5), %v795_v59, %v794_v58  ;;  %v797_v62 = vld [vmem:[%s3381_s11 + $0x38] sm:$0xff] (!%p2341_p5)  ;;  %v783_v0 = vld [vmem:[%s3379_s8 + $0x8] sm:$0xff] (!%p2341_p5)  ;;  %v784_v1 = vld [vmem:[%s3379_s8 + $0x10] sm:$0xff] (!%p2341_p5)  ;;  %v4358_v57 = vmov (!%p2341_p5), 0  ;;  %v4362_v58 = vmov (!%p2341_p5), 0  ;;  %v4364_v59 = vmov (!%p2341_p5), 0 }
  0xb5   : > { %2616 = vmatpush3.bf16.xpose.msk.msra.mxu0 (!%p2341_p5), %vm3443_vm3, %v2611_v53  ;;  %v2629_v63 = vpack.c.bf16 (!%p2341_p5), %v797_v62, %v796_v61  ;;  %v785_v2 = vld [vmem:[%s3379_s8 + $0x18] sm:$0xff] (!%p2341_p5)  ;;  %v786_v3 = vld [vmem:[%s3379_s8 + $0x20] sm:$0xff] (!%p2341_p5)  ;;  %v787_v4 = vld [vmem:[%s3379_s8 + $0x28] sm:$0xff] (!%p2341_p5)  ;;  %v639_v12 = vadd.s32 (!%p2341_p5), 16, %v637_v8  ;;  %v638_v17 = vadd.s32 (!%p2341_p5), 8, %v637_v8  ;;  %v640_v21 = vadd.s32 (!%p2341_p5), 24, %v637_v8 }
  0xb6   : > { %2619 = vmatprep.subr.msk.bf16.mxu0 (!%p2341_p5), %vm3443_vm3, %v2617_v56  ;;  %v788_v5 = vld [vmem:[%s3379_s8 + $0x30] sm:$0xff] (!%p2341_p5)  ;;  %v789_v6 = vld [vmem:[%s3379_s8 + $0x38] sm:$0xff] (!%p2341_p5)  ;;  %v642_v23 = vadd.s32 (!%p2341_p5), 40, %v637_v8  ;;  %v641_v32 = vadd.s32 (!%p2341_p5), 32, %v637_v8  ;;  %v643_v37 = vadd.s32 (!%p2341_p5), 48, %v637_v8  ;;  %v644_v39 = vadd.s32 (!%p2341_p5), 56, %v637_v8 }
  0xb7   : > { %s2342_s21 = sshll.u32 (!%p2341_p5), %s4344_s25, 2  ;;  %s2343_s10 = sshll.u32 (!%p2341_p5), %s4344_s25, 6 }
  0xb8   : > { %s633_s23 = sadd.s32 (!%p2341_p5), %s4345_s26, %s2342_s21  ;;  %v645_v10 = vstv (!%p2341_p5), %s2343_s10 }
  0xb9   : > { %s634_s0 = sld [smem:[#allocation6 + %s633_s23]]  ;;  %v646_v13 = vadd.s32 %v645_v10, %v637_v8  ;;  %v3489_v15 = vadd.s32 %v645_v10, %v639_v12  ;;  %v3494_v20 = vadd.s32 %v645_v10, %v638_v17  ;;  %v3498_v26 = vadd.s32 %v645_v10, %v640_v21 }
  0xba   : > { %v3500_v28 = vadd.s32 %v645_v10, %v642_v23  ;;  %v3513_v36 = vadd.s32 %v645_v10, %v641_v32  ;;  %v3519_v42 = vadd.s32 %v645_v10, %v643_v37  ;;  %v3524_v43 = vadd.s32 %v645_v10, %v644_v39  ;;  %v798_v39 = vld [vmem:[%s3383_s15] sm:$0xff] }
  0xbb   : > { %vm699_vm5 = vcmp.eq.s32.totalorder %v646_v13, 0  ;;  %vm701_vm7 = vcmp.eq.s32.totalorder %v3489_v15, 0  ;;  %vm724_vm12 = vcmp.eq.s32.totalorder %v646_v13, 5  ;;  %vm726_vm14 = vcmp.eq.s32.totalorder %v3489_v15, 5 }
  0xbc   : > { %vm700_vm0 = vcmp.eq.s32.totalorder %v3494_v20, 0 }
  0xbd   : > { %2622 = vmatpush3.bf16.xpose.msk.msra.mxu0 %vm3443_vm3, %v2617_v56  ;;  %v4356_v56 = vmov 0 }
  0xbe   : > { %2625 = vmatprep.subr.msk.bf16.mxu0 %vm3443_vm3, %v2623_v60 }
  0xbf   : > { %s2344_s29 = sshll.u32 %s634_s0, 6 }
  0xc0   : > { %v657_v11 = vstv %s2344_s29 }
  0xc1   : > { %v3487_v14 = vadd.s32 %v657_v11, %v656_v9 }
  0xc3   : > { %v659_v16 = vsub.s32 %v646_v13, %v3487_v14  ;;  %v661_v18 = vsub.s32 %v3489_v15, %v3487_v14  ;;  %v660_v25 = vsub.s32 %v3494_v20, %v3487_v14  ;;  %v662_v30 = vsub.s32 %v3498_v26, %v3487_v14 }
  0xc4   : > { %v664_v31 = vsub.s32 %v3500_v28, %v3487_v14  ;;  %vm4318_vm9 = vcmp.eq.s32.totalorder %v3487_v14, 0  ;;  %v663_v41 = vsub.s32 %v3513_v36, %v3487_v14  ;;  %v665_v47 = vsub.s32 %v3519_v42, %v3487_v14 }
  0xc5   : > { %2628 = vmatpush3.bf16.xpose.msk.msra.mxu0 %vm3443_vm3, %v2623_v60  ;;  %v668_v19 = vsub.s32 0, %v659_v16  ;;  %v674_v22 = vsub.s32 0, %v661_v18  ;;  %v671_v29 = vsub.s32 0, %v660_v25  ;;  %v677_v34 = vsub.s32 0, %v662_v30  ;;  %v2400_v60 = vld [vmem:[%s3383_s15 + $0x78] sm:$0xff] }
  0xc6   : > { %2631 = vmatprep.subr.msk.bf16.mxu0 %vm3443_vm3, %v2629_v63  ;;  %v683_v35 = vsub.s32 0, %v664_v31  ;;  %v680_v46 = vsub.s32 0, %v663_v41  ;;  %v666_v48 = vsub.s32 %v3524_v43, %v3487_v14  ;;  %v686_v51 = vsub.s32 0, %v665_v47 }
  0xc7   : > { %v2345_v24 = vmin.u32 %v668_v19, %v659_v16  ;;  %v2347_v27 = vmin.u32 %v674_v22, %v661_v18  ;;  %v2346_v33 = vmin.u32 %v671_v29, %v660_v25  ;;  %v2348_v38 = vmin.u32 %v677_v34, %v662_v30 }
  0xc8   : > { %v2350_v40 = vmin.u32 %v683_v35, %v664_v31  ;;  %v2349_v50 = vmin.u32 %v680_v46, %v663_v41  ;;  %v689_v52 = vsub.s32 0, %v666_v48  ;;  %v2351_v53 = vmin.u32 %v686_v51, %v665_v47  ;;  %v3703_v46 = vld [vmem:[#allocation2 + $0x10] sm:$0xff] }
  0xc9   : > { %vm691_vm4 = vcmp.le.s32.totalorder %v2345_v24, 16  ;;  %vm693_vm6 = vcmp.le.s32.totalorder %v2347_v27, 16  ;;  %vm692_vm15 = vcmp.le.s32.totalorder %v2346_v33, 16  ;;  %v800_v47 = vld [vmem:[%s3383_s15 + $0x10] sm:$0xff] }
  0xca   : > { %vm707_vm8 = vmor %vm691_vm4, %vm699_vm5  ;;  %vm4315_vm4 = vcmp.eq.s32.totalorder %v3487_v14, 5  ;;  %v2352_v55 = vmin.u32 %v689_v52, %v666_v48  ;;  %v801_v48 = vld [vmem:[%s3383_s15 + $0x18] sm:$0xff] }
  0xcb   : > { %vm709_vm10 = vmor %vm693_vm6, %vm701_vm7 }
  0xcc   : > { %vm716_vm11 = vmor %vm707_vm8, %vm4318_vm9  ;;  %vm749_vm8 = vcmp.eq.s32.totalorder %v646_v13, 130 }
  0xcd   : > { %2634 = vmatpush3.bf16.xpose.msk.msra.mxu0 %vm3443_vm3, %v2629_v63  ;;  %vm718_vm13 = vmor %vm709_vm10, %vm4318_vm9  ;;  %vm694_vm10 = vcmp.le.s32.totalorder %v2348_v38, 16  ;;  %v3094_v63 = vmov -1e+30   ;;  %v3095_v38 = vmov 0  }
  0xce   : > { %vm732_vm1 = vmor %vm716_vm11, %vm724_vm12  ;;  %vm696_vm12 = vcmp.le.s32.totalorder %v2350_v40, 16  ;;  %2820 = vset.pattern.permute.xlu0 %v3095_v38  ;;  %2821 = vset.pattern.permute.xlu1 %v3095_v38  ;;  %v799_v40 = vld [vmem:[%s3383_s15 + $0x8] sm:$0xff] }
  0xcf   : > { %vm734_vm5 = vmor %vm718_vm13, %vm726_vm14  ;;  %vm704_vm13 = vcmp.eq.s32.totalorder %v3500_v28, 0  ;;  %v2635_v41 = vpack.c.bf16 %v799_v40, %v798_v39 }
  0xd0   : > { %vm708_vm6 = vmor %vm692_vm15, %vm700_vm0  ;;  %vm725_vm15 = vcmp.eq.s32.totalorder %v3494_v20, 5 }
  0xd1   : > { %vm741_vm7 = vmor %vm732_vm1, %vm4315_vm4  ;;  %2636 = vmatprep.subr.bf16.mxu1 %v2635_v41 }
  0xd2   : > { %vm3528_vm11 = vmor %vm734_vm5, %vm4315_vm4  ;;  %vm751_vm5 = vcmp.eq.s32.totalorder %v3489_v15, 130  ;;  %2638 = vmatpush3.bf16.msra.mxu1 %v2635_v41 }
  0xd3   : > { %vm717_vm14 = vmor %vm708_vm6, %vm4318_vm9 }
  0xd4   : > { %2516 = vmatmul.mubr.msk.f32.vlgmr.msra.gmra.mrb[0].mxu0 %vm4314_vm2, %v783_v0  ;;  %vm3536_vm0 = vmor %vm741_vm7, %vm749_vm8  ;;  %vm727_vm7 = vcmp.eq.s32.totalorder %v3498_v26, 5 }
  0xd5   : > { %2518 = vmatprep.mubr.msk.f32.mxu0 %vm4314_vm2, %v784_v1  ;;  %v4349_v45 = vsel %vm3536_vm0, 4294967295, %v4348_v45  ;;  %vm712_vm4 = vmor %vm696_vm12, %vm704_vm13  ;;  %vm4352_vm12 = vcmp.eq.s32.totalorder %v3487_v14, 5  ;;  %vm695_vm0 = vcmp.le.s32.totalorder %v2349_v50, 16  ;;  %v2639_v50 = vpack.c.bf16 %v801_v48, %v800_v47 }
  0xd6   : > { %vm733_vm3 = vmor %vm717_vm14, %vm725_vm15  ;;  %vm750_vm14 = vcmp.eq.s32.totalorder %v3494_v20, 130 }
  0xd7   : > { %vm3550_vm8 = vmor %vm3528_vm11, %vm751_vm5  ;;  %vm765_vm11 = vcmp.eq.s32.totalorder %v3487_v14, 130  ;;  %2640 = vmatprep.subr.bf16.mxu1 %v2639_v50 }
  0xd8   : > { %2519 = vmatmul.mubr.msk.f32.gmra.mrb[2].mxu0 %vm4314_vm2, %v785_v2  ;;  %v4351_v49 = vsel %vm3550_vm8, 4294967295, %v4350_v49  ;;  %vm742_vm13 = vmor %vm733_vm3, %vm4352_vm12  ;;  %vm703_vm8 = vcmp.eq.s32.totalorder %v3513_v36, 0  ;;  %vm752_vm3 = vcmp.eq.s32.totalorder %v3498_v26, 130  ;;  %2642 = vmatpush3.bf16.msra.mxu1 %v2639_v50 }
  0xd9   : > { %2521 = vmatprep.mubr.msk.f32.mxu0 %vm4314_vm2, %v786_v3  ;;  %vm758_vm5 = vmor %vm742_vm13, %vm750_vm14 }
  0xda   : > { %vm711_vm13 = vmor %vm695_vm0, %vm703_vm8  ;;  %vm4360_vm0 = vcmp.eq.s32.totalorder %v3487_v14, 0 }
  0xdb   : > { %vm720_vm8 = vmor %vm711_vm13, %vm4360_vm0  ;;  %vm4366_vm13 = vcmp.eq.s32.totalorder %v3487_v14, 0 }
  0xdc   : > { %2522 = vmatmul.mubr.msk.f32.gmra.mrb[4].mxu0 %vm4314_vm2, %v787_v4 }
  0xdd   : > { %2524 = vmatprep.mubr.msk.f32.mxu0 %vm4314_vm2, %v788_v5 }
  0xe0   : > { %2525 = vmatmul.mubr.msk.f32.gmra.mrb[6].mxu0 %vm4314_vm2, %v789_v6  ;;  %vm702_vm2 = vcmp.eq.s32.totalorder %v3498_v26, 0 }
  0xe1   : > { %vm710_vm1 = vmor %vm694_vm10, %vm702_vm2  ;;  %vm729_vm10 = vcmp.eq.s32.totalorder %v3500_v28, 5 }
  0xe2   : > { %vm719_vm6 = vmor %vm710_vm1, %vm4318_vm9 }
  0xe3   : > { %vm721_vm2 = vmor %vm712_vm4, %vm4318_vm9 }
  0xe4   : > { %vm735_vm15 = vmor %vm719_vm6, %vm727_vm7  ;;  %vm754_vm7 = vcmp.eq.s32.totalorder %v3500_v28, 130 }
  0xe5   : > { %vm737_vm1 = vmor %vm721_vm2, %vm729_vm10  ;;  %vm4355_vm2 = vnez %v4349_v45  ;;  %v3701_v45 = vld [vmem:[#allocation2 + $0x8] sm:$0xff] }
  0xe6   : > { %vm4353_vm4 = vmmov %vm4352_vm12 }
  0xe7   : > { %vm744_vm9 = vmor %vm735_vm15, %vm4353_vm4  ;;  %vm705_vm15 = vcmp.eq.s32.totalorder %v3519_v42, 0 }
  0xe8   : > { %vm4354_vm12 = vmmov %vm4353_vm4  ;;  %vm697_vm4 = vcmp.le.s32.totalorder %v2351_v53, 16 }
  0xe9   : > { %vm746_vm6 = vmor %vm737_vm1, %vm4354_vm12 }
  0xea   : > { %vm3572_vm10 = vmor %vm4355_vm2, %vm765_vm11  ;;  %vm698_vm2 = vcmp.le.s32.totalorder %v2352_v55, 16 }
  0xeb   : > { %v4357_v56 = vsel %vm3572_vm10, 4294967295, %v4356_v56  ;;  %vm760_vm14 = vmor %vm744_vm9, %vm752_vm3  ;;  %vm706_vm10 = vcmp.eq.s32.totalorder %v3524_v43, 0  ;;  %vm728_vm3 = vcmp.eq.s32.totalorder %v3513_v36, 5  ;;  %vm4361_vm9 = vnez %v4351_v49 }
  0xec   : > { %vm3579_vm1 = vmor %vm758_vm5, %vm765_vm11 }
  0xed   : > { %v4359_v57 = vsel %vm3579_vm1, 4294967295, %v4358_v57  ;;  %vm762_vm12 = vmor %vm746_vm6, %vm754_vm7 }
  0xee   : > { %vm3591_vm5 = vmor %vm4361_vm9, %vm765_vm11 }
  0xef   : > { %v4363_v58 = vsel %vm3591_vm5, 4294967295, %v4362_v58  ;;  %vm713_vm1 = vmor %vm697_vm4, %vm705_vm15  ;;  %vm730_vm5 = vcmp.eq.s32.totalorder %v3519_v42, 5 }
  0xf0   : > { %vm714_vm6 = vmor %vm698_vm2, %vm706_vm10  ;;  %vm4370_vm2 = vcmp.eq.s32.totalorder %v3487_v14, 5 }
  0xf1   : > { %vm3597_vm7 = vmor %vm760_vm14, %vm765_vm11  ;;  %vm731_vm14 = vcmp.eq.s32.totalorder %v3524_v43, 5 }
  0xf2   : > { %v4365_v59 = vsel %vm3597_vm7, 4294967295, %v4364_v59  ;;  %vm736_vm0 = vmor %vm720_vm8, %vm728_vm3  ;;  %vm753_vm8 = vcmp.eq.s32.totalorder %v3513_v36, 130  ;;  %vm4371_vm3 = vnez %v4357_v56  ;;  %v3718_v56 = vld [vmem:[#allocation2 + $0x18] sm:$0xff] }
  0xf3   : > { %vm722_vm9 = vmor %vm713_vm1, %vm4366_vm13  ;;  %v3618_v0 = vsel %vm4371_vm3, 0.0, %v3094_v63  ;;  %vm4377_vm3 = vnez %v4365_v59  ;;  %v803_v59 = vld [vmem:[%s3383_s15 + $0x28] sm:$0xff] }
  0xf4   : > { %vm3606_vm4 = vmor %vm762_vm12, %vm765_vm11  ;;  %v3646_v12 = vsel %vm4377_vm3, 0.0, %v3094_v63 }
  0xf5   : > { %vm4369_vm10 = vmmov %vm4366_vm13  ;;  %v3653_v18 = vsel %vm3606_vm4, 0.0, %v3094_v63 }
  0xf6   : > { %vm723_vm15 = vmor %vm714_vm6, %vm4369_vm10  ;;  %vm4372_vm6 = vnez %v4359_v57  ;;  %v3720_v57 = vld [vmem:[#allocation2 + $0x20] sm:$0xff] }
  0xf7   : > { %vm745_vm7 = vmor %vm736_vm0, %vm4370_vm2  ;;  %v3622_v3 = vsel %vm4372_vm6, 0.0, %v3094_v63 }
  0xf8   : > { %vm738_vm1 = vmor %vm722_vm9, %vm730_vm5 }
  0xf9   : > { %vm739_vm12 = vmor %vm723_vm15, %vm731_vm14  ;;  %vm756_vm15 = vcmp.eq.s32.totalorder %v3524_v43, 130 }
  0xfa   : > { %vm761_vm13 = vmor %vm745_vm7, %vm753_vm8  ;;  %vm4375_vm7 = vnez %v4363_v58  ;;  %vm4376_vm8 = vcmask 523264   ;;  %v802_v58 = vld [vmem:[%s3383_s15 + $0x20] sm:$0xff] }
  0xfb   : > { %vm4373_vm0 = vmmov %vm4370_vm2  ;;  %vm755_vm2 = vcmp.eq.s32.totalorder %v3519_v42, 130  ;;  %v3635_v7 = vsel %vm4375_vm7, 0.0, %v3094_v63  ;;  %v3696_v42 = vld [vmem:[#allocation2] sm:$0xff]  ;;  %vm4385_vm7 = vnez %v4343_v54  ;;  %v2384_v54 = vld [vmem:[%s3379_s8 + $0x78] sm:$0xff] }
  0xfc   : > { %vm747_vm10 = vmor %vm738_vm1, %vm4373_vm0 }
  0xfd   : > { %vm4374_vm5 = vmmov %vm4373_vm0 }
  0xfe   : > { %vm748_vm9 = vmor %vm739_vm12, %vm4374_vm5 }
  0xff   : > { %vm770_vm14 = vmor %vm761_vm13, %vm765_vm11 }
 0x100   : > { %vm763_vm1 = vmor %vm747_vm10, %vm755_vm2  ;;  %v3655_v19 = vsel %vm770_vm14, 0.0, %v3094_v63 }
 0x101   : > { %vm764_vm12 = vmor %vm748_vm9, %vm756_vm15  ;;  %vm1152_vm15 = vcmask 7168  }
 0x102   : > { %vm772_vm13 = vmor %vm763_vm1, %vm765_vm11 }
 0x103   : > { %vm4378_vm6 = vmmov %vm4376_vm8  ;;  %v3674_v29 = vsel %vm772_vm13, 0.0, %v3094_v63 }
 0x104   : > { %vm4379_vm0 = vmmov %vm4378_vm6 }
 0x105   : > { %vm773_vm10 = vmor %vm764_vm12, %vm765_vm11 }
 0x106   : > { %v3676_v30 = vsel %vm773_vm10, 0.0, %v3094_v63  ;;  %vm4380_vm4 = vmmov %vm4379_vm0 }
 0x107   : > { %vm4381_vm11 = vmmov %vm4379_vm0 }
 0x108   : > { %vm4382_vm2 = vmmov %vm4379_vm0 }
 0x109   : > { %vm4383_vm5 = vmmov %vm4379_vm0 }
 0x10a   : > { %vm4384_vm9 = vmmov %vm4379_vm0 }
 0x10b   : > { %vm4386_vm14 = vmmov %vm4379_vm0 }
 0x10c   : > { %vm4388_vm1 = vmmov %vm4379_vm0 }
 0x10d   : > { %vm4389_vm3 = vmmov %vm4379_vm0 }
 0x10e   : > { %vm4390_vm12 = vmmov %vm4379_vm0 }
 0x10f   : > { %vm4391_vm13 = vmmov %vm4379_vm0 }
 0x110   : > { %vm4393_vm10 = vmmov %vm4379_vm0 }
 0x1a7   : > { %v2517_v61 = vpop.f32.mrb[0].mxu0 }
 0x1a8   : > { %v921_v62 = vpop.f32.mrb[1].mxu0  ;;  %v961_v1 = vmul.f32 0.125, %v2517_v61 }
 0x1a9   : > { %v960_v2 = vmul.f32 0.125, %v921_v62  ;;  %v2643_v62 = vpack.c.bf16 %v803_v59, %v802_v58 }
 0x1aa   : > { %v3642_v11 = vadd.f32 %v961_v1, %v3622_v3 }
 0x1ab   : > { %v2520_v4 = vpop.f32.mrb[2].mxu0  ;;  %v3628_v5 = vadd.f32 %v960_v2, %v3618_v0  ;;  %2644 = vmatprep.subr.bf16.mxu1 %v2643_v62 }
 0x1ac   : > { %v931_v6 = vpop.f32.mrb[3].mxu0  ;;  %v963_v8 = vmul.f32 0.125, %v2520_v4  ;;  %v987_v21 = vsel %vm4379_vm0, %v3642_v11, -inf  ;;  %v3736_v4 = vld [vmem:[#allocation2 + $0x28] sm:$0xff]  ;;  %2646 = vmatpush3.bf16.msra.mxu1 %v2643_v62 }
 0x1ad   : > { %v962_v9 = vmul.f32 0.125, %v931_v6  ;;  %v984_v10 = vsel %vm4376_vm8, %v3628_v5, -inf  ;;  %vm4387_vm8 = vmmov %vm4379_vm0 }
 0x1ae   : > { %985 = vmax.xlane.f32.xlu0 %v984_v10  ;;  %v3664_v22 = vadd.f32 %v963_v8, %v3646_v12  ;;  %v3741_v8 = vld [vmem:[#allocation2 + $0x30] sm:$0xff]  ;;  %v805_v10 = vld [vmem:[%s3383_s15 + $0x38] sm:$0xff] }
 0x1af   : > { %v3649_v13 = vadd.f32 %v962_v9, %v3635_v7  ;;  %v2523_v15 = vpop.f32.mrb[4].mxu0  ;;  %v804_v9 = vld [vmem:[%s3383_s15 + $0x30] sm:$0xff] }
 0x1b0   : > { %v965_v16 = vmul.f32 0.125, %v2523_v15  ;;  %v941_v17 = vpop.f32.mrb[5].mxu0  ;;  %v993_v31 = vsel %vm4380_vm4, %v3664_v22, -inf  ;;  %vm4394_vm4 = vmmov %vm4379_vm0  ;;  %v2399_v15 = vld [vmem:[%s3383_s15 + $0x70] sm:$0xff] }
 0x1b1   : > { %v990_v20 = vsel %vm4378_vm6, %v3649_v13, -inf  ;;  %v964_v23 = vmul.f32 0.125, %v941_v17  ;;  %v2647_v17 = vpack.c.bf16 %v805_v10, %v804_v9  ;;  %vm4392_vm6 = vmmov %vm4379_vm0 }
 0x1b2   : > { %991 = vmax.xlane.f32.xlu1 %v990_v20  ;;  %988 = vmax.xlane.f32.xlu0 %v987_v21  ;;  %v3669_v24 = vadd.f32 %v965_v16, %v3653_v18 }
 0x1b3   : > { %v2526_v25 = vpop.f32.mrb[6].mxu0  ;;  %v3672_v26 = vadd.f32 %v964_v23, %v3655_v19  ;;  %2648 = vmatprep.subr.bf16.mxu1 %v2647_v17 }
 0x1b4   : > { %v967_v27 = vmul.f32 0.125, %v2526_v25  ;;  %v951_v28 = vpop.f32.mrb[7].mxu0  ;;  %v999_v33 = vsel %vm4382_vm2, %v3669_v24, -inf  ;;  %2650 = vmatpush3.bf16.msra.mxu1 %v2647_v17  ;;  %vm4396_vm2 = vmmov %vm4379_vm0 }
 0x1b5   : > { %v966_v14 = vmul.f32 0.125, %v951_v28  ;;  %v996_v32 = vsel %vm4381_vm11, %v3672_v26, -inf  ;;  %vm4395_vm11 = vmmov %vm4379_vm0  ;;  %v3976_v28 = vld [vmem:[#allocation2 + $0x70] sm:$0xff] }
 0x1b6   : > { %994 = vmax.xlane.f32.xlu1 %v993_v31  ;;  %997 = vmax.xlane.f32.xlu0 %v996_v32  ;;  %v3688_v35 = vadd.f32 %v967_v27, %v3676_v30  ;;  %v3760_v27 = vld [vmem:[#allocation2 + $0x38] sm:$0xff]  ;;  %v2398_v31 = vld [vmem:[%s3383_s15 + $0x68] sm:$0xff] }
 0x1b7   : > { %v3685_v34 = vadd.f32 %v966_v14, %v3674_v29 }
 0x1b8   : > { %v1005_v37 = vsel %vm4384_vm9, %v3688_v35, -inf  ;;  %vm4398_vm9 = vmmov %vm4379_vm0 }
 0x1b9   : > { %v1002_v36 = vsel %vm4383_vm5, %v3685_v34, -inf  ;;  %vm4397_vm5 = vmmov %vm4379_vm0 }
 0x1ba   : > { %1000 = vmax.xlane.f32.xlu1 %v999_v33  ;;  %1003 = vmax.xlane.f32.xlu0 %v1002_v36  ;;  %v2385_v36 = vld [vmem:[%s3381_s11 + $0x40] sm:$0xff] }
 0x1bb   : > { %v2397_v33 = vld [vmem:[%s3383_s15 + $0x60] sm:$0xff] }
 0x1bc   : > { %v2683_v16 = vpack.c.bf16 %v2398_v31, %v2397_v33 }
 0x1be   : > { %1006 = vmax.xlane.f32.xlu1 %v1005_v37  ;;  %v2386_v37 = vld [vmem:[%s3381_s11 + $0x48] sm:$0xff] }
 0x1bf   : > { %v2651_v38 = vpack.c.bf16 %v2386_v37, %v2385_v36  ;;  %v2390_v36 = vld [vmem:[%s3381_s11 + $0x68] sm:$0xff] }
 0x1c1   : > { %2653 = vmatprep.subr.msk.bf16.mxu1 %vm4385_vm7, %v2651_v38 }
 0x23b   : > { %v986_v43 = vpop.xlane.xlu0 %985 }
 0x23c   : > { %v3699_v44 = vmax.f32 %v3696_v42, %v986_v43 }
 0x23e   : > { %1362 = vst.msk [vmem:[#allocation2] sm:$0xff] %vm1152_vm15, %v3699_v44  ;;  %1042 = vperm.xlu0 %2820, %v3699_v44  }
 0x23f   : > { %v992_v51 = vpop.xlane.xlu1 %991  ;;  %v989_v52 = vpop.xlane.xlu0 %988 }
 0x240   : > { %v3713_v53 = vmax.f32 %v3703_v46, %v992_v51  ;;  %v3716_v55 = vmax.f32 %v3701_v45, %v989_v52 }
 0x242   : > { %1364 = vst.msk [vmem:[#allocation2 + $0x10] sm:$0xff] %vm1152_vm15, %v3713_v53  ;;  %1363 = vst.msk [vmem:[#allocation2 + $0x8] sm:$0xff] %vm1152_vm15, %v3716_v55  ;;  %1047 = vperm.xlu1 %2821, %v3716_v55  }
 0x243   : > { %v995_v63 = vpop.xlane.xlu1 %994  ;;  %v998_v1 = vpop.xlane.xlu0 %997 }
 0x244   : > { %v3734_v2 = vmax.f32 %v3718_v56, %v995_v63  ;;  %v3739_v6 = vmax.f32 %v3720_v57, %v998_v1  ;;  %v2387_v1 = vld [vmem:[%s3381_s11 + $0x50] sm:$0xff] }
 0x246   : > { %1365 = vst.msk [vmem:[#allocation2 + $0x18] sm:$0xff] %vm1152_vm15, %v3734_v2  ;;  %1057 = vperm.xlu1 %2821, %v3734_v2   ;;  %1366 = vst.msk [vmem:[#allocation2 + $0x20] sm:$0xff] %vm1152_vm15, %v3739_v6 }
 0x247   : > { %v1001_v20 = vpop.xlane.xlu1 %1000  ;;  %v1004_v21 = vpop.xlane.xlu0 %1003 }
 0x248   : > { %v3755_v23 = vmax.f32 %v3736_v4, %v1001_v20  ;;  %v3758_v25 = vmax.f32 %v3741_v8, %v1004_v21 }
 0x24a   : > { %1052 = vperm.xlu1 %2821, %v3713_v53   ;;  %1367 = vst.msk [vmem:[#allocation2 + $0x28] sm:$0xff] %vm1152_vm15, %v3755_v23  ;;  %1368 = vst.msk [vmem:[#allocation2 + $0x30] sm:$0xff] %vm1152_vm15, %v3758_v25 }
 0x24b   : > { %v1007_v14 = vpop.xlane.xlu1 %1006 }
 0x24c   : > { %v3772_v32 = vmax.f32 %v3760_v27, %v1007_v14  ;;  %v2389_v14 = vld [vmem:[%s3381_s11 + $0x60] sm:$0xff] }
 0x24e   : > { %1067 = vperm.xlu1 %2821, %v3755_v23   ;;  %1369 = vst.msk [vmem:[#allocation2 + $0x38] sm:$0xff] %vm1152_vm15, %v3772_v32 }
 0x252   : > { %1062 = vperm.xlu1 %2821, %v3739_v6  }
 0x256   : > { %1072 = vperm.xlu1 %2821, %v3758_v25  }
 0x25a   : > { %1077 = vperm.xlu1 %2821, %v3772_v32  }
 0x2bd   : > { %v1043_v39 = vpop.permute.xlu0 %1042 }
 0x2be   : > { %v1080_v40 = vsub.f32 %v3628_v5, %v1043_v39  ;;  %v2388_v5 = vld [vmem:[%s3381_s11 + $0x58] sm:$0xff]  ;;  %v2663_v39 = vpack.c.bf16 %v2390_v36, %v2389_v14 }
 0x2c0   : > { %v1088_v41 = vmul.f32 1.442695, %v1080_v40 }
 0x2c1   : > { %v1048_v43 = vpop.permute.xlu1 %1047 }
 0x2c2   : > { %2822 = vpow2.f32 %v1088_v41  ;;  %v1081_v47 = vsub.f32 %v3642_v11, %v1048_v43  ;;  %v2657_v11 = vpack.c.bf16 %v2388_v5, %v2387_v1  ;;  %v2379_v1 = vld [vmem:[%s3379_s8 + $0x50] sm:$0xff]  ;;  %v2380_v5 = vld [vmem:[%s3379_s8 + $0x58] sm:$0xff] }
 0x2c4   : > { %v1090_v48 = vmul.f32 1.442695, %v1081_v47  ;;  %v2391_v47 = vld [vmem:[%s3381_s11 + $0x70] sm:$0xff] }
 0x2c5   : > { %v1058_v50 = vpop.permute.xlu1 %1057 }
 0x2c6   : > { %2824 = vpow2.f32 %v1090_v48  ;;  %v1083_v51 = vsub.f32 %v3664_v22, %v1058_v50  ;;  %v2392_v48 = vld [vmem:[%s3381_s11 + $0x78] sm:$0xff] }
 0x2c7   : > { %v2669_v50 = vpack.c.bf16 %v2392_v48, %v2391_v47 }
 0x2c8   : > { %v1094_v62 = vmul.f32 1.442695, %v1083_v51 }
 0x2c9   : > { %v1053_v52 = vpop.permute.xlu1 %1052 }
 0x2ca   : > { %v1082_v58 = vsub.f32 %v3649_v13, %v1053_v52 }
 0x2cc   : > { %v3790_v59 = vpop.eup %2822  ;;  %v1092_v63 = vmul.f32 1.442695, %v1082_v58  ;;  %v2377_v58 = vld [vmem:[%s3379_s8 + $0x40] sm:$0xff] }
 0x2cd   : > { %v1068_v9 = vpop.permute.xlu1 %1067  ;;  %2543 = vmatprep.mubr.msk.f32.mxu1 %vm4386_vm14, %v3790_v59  ;;  %vm4399_vm14 = vmmov %vm4379_vm0 }
 0x2ce   : > { %2826 = vpow2.f32 %v1092_v63  ;;  %v1085_v22 = vsub.f32 %v3669_v24, %v1068_v9  ;;  %v2378_v63 = vld [vmem:[%s3379_s8 + $0x48] sm:$0xff]  ;;  %v2381_v9 = vld [vmem:[%s3379_s8 + $0x60] sm:$0xff] }
 0x2cf   : > { %2828 = vpow2.f32 %v1094_v62 }
 0x2d0   : > { %v3796_v10 = vpop.eup %2824  ;;  %v1098_v20 = vmul.f32 1.442695, %v1085_v22  ;;  %v2383_v22 = vld [vmem:[%s3379_s8 + $0x70] sm:$0xff] }
 0x2d1   : > { %v1063_v13 = vpop.permute.xlu1 %1062  ;;  %2544 = vmatmul.mubr.msk.f32.vlgmr.msra.gmra.mrb[0].mxu1 %vm4387_vm8, %v3796_v10  ;;  %vm4401_vm8 = vmmov %vm4379_vm0 }
 0x2d2   : > { %v1084_v17 = vsub.f32 %v3672_v26, %v1063_v13  ;;  %2656 = vmatpush3.bf16.xpose.msk.msra.mxu1 %vm4385_vm7, %v2651_v38 }
 0x2d3   : > { %2659 = vmatprep.subr.msk.bf16.mxu1 %vm4385_vm7, %v2657_v11 }
 0x2d4   : > { %v1096_v21 = vmul.f32 1.442695, %v1084_v17 }
 0x2d5   : > { %v1073_v37 = vpop.permute.xlu1 %1072 }
 0x2d6   : > { %2830 = vpow2.f32 %v1096_v21  ;;  %v1086_v24 = vsub.f32 %v3685_v34, %v1073_v37 }
 0x2d7   : > { %2832 = vpow2.f32 %v1098_v20 }
 0x2d8   : > { %v3809_v40 = vpop.eup %2826  ;;  %v1100_v26 = vmul.f32 1.442695, %v1086_v24 }
 0x2d9   : > { %v1078_v41 = vpop.permute.xlu1 %1077  ;;  %2546 = vmatprep.mubr.msk.f32.mxu1 %vm4388_vm1, %v3809_v40  ;;  %v3813_v38 = vpop.eup %2828  ;;  %vm4402_vm1 = vmmov %vm4379_vm0 }
 0x2da   : > { %2834 = vpow2.f32 %v1100_v26  ;;  %v1087_v43 = vsub.f32 %v3688_v35, %v1078_v41  ;;  %2662 = vmatpush3.bf16.xpose.msk.msra.mxu1 %vm4385_vm7, %v2657_v11  ;;  %v2382_v11 = vld [vmem:[%s3379_s8 + $0x68] sm:$0xff] }
 0x2db   : > { %2547 = vmatmul.mubr.msk.f32.gmra.mrb[2].mxu1 %vm4389_vm3, %v3813_v38  ;;  %2665 = vmatprep.subr.msk.bf16.mxu1 %vm4385_vm7, %v2663_v39  ;;  %vm4403_vm3 = vmmov %vm4379_vm0 }
 0x2dc   : > { %v1102_v34 = vmul.f32 1.442695, %v1087_v43 }
 0x2de   : > { %2836 = vpow2.f32 %v1102_v34 }
 0x2e0   : > { %v3824_v51 = vpop.eup %2830 }
 0x2e1   : > { %2549 = vmatprep.mubr.msk.f32.mxu1 %vm4390_vm12, %v3824_v51  ;;  %v3828_v35 = vpop.eup %2832  ;;  %vm4404_vm12 = vmmov %vm4379_vm0 }
 0x2e2   : > { %2668 = vmatpush3.bf16.xpose.msk.msra.mxu1 %vm4385_vm7, %v2663_v39 }
 0x2e3   : > { %2550 = vmatmul.mubr.msk.f32.gmra.mrb[4].mxu1 %vm4391_vm13, %v3828_v35  ;;  %2671 = vmatprep.subr.msk.bf16.mxu1 %vm4385_vm7, %v2669_v50  ;;  %vm4405_vm13 = vmmov %vm4379_vm0 }
 0x2e4   : > { %v3836_v52 = vpop.eup %2834 }
 0x2e5   : > { %2552 = vmatprep.mubr.msk.f32.mxu1 %vm4392_vm6, %v3836_v52  ;;  %vm4406_vm6 = vmmov %vm4379_vm0 }
 0x2e8   : > { %v3841_v62 = vpop.eup %2836 }
 0x2e9   : > { %2553 = vmatmul.mubr.msk.f32.gmra.mrb[6].mxu1 %vm4379_vm0, %v3841_v62 }
 0x2ea   : > { %2674 = vmatpush3.bf16.xpose.msk.msra.mxu1 %vm4385_vm7, %v2669_v50  ;;  %2571 = vmatprep.mubr.msk.f32.mxu1 %vm4393_vm10, %v2377_v58  ;;  %vm4400_vm7 = vmmov %vm4379_vm0 }
 0x2eb   : > { %vm4407_vm10 = vmmov %vm4379_vm0 }
 0x2f1   : > { %2572 = vmatmul.mubr.msk.f32.vlgmr.msra.gmra.mrb[8].mxu1 %vm4394_vm4, %v2378_v63  ;;  %vm4408_vm4 = vmmov %vm4379_vm0 }
 0x2f2   : > { %2574 = vmatprep.mubr.msk.f32.mxu1 %vm4395_vm11, %v2379_v1  ;;  %vm4409_vm11 = vmmov %vm4379_vm0 }
 0x2f5   : > { %2575 = vmatmul.mubr.msk.f32.gmra.mrb[10].mxu1 %vm4396_vm2, %v2380_v5  ;;  %vm4410_vm2 = vmmov %vm4379_vm0 }
 0x2f6   : > { %2577 = vmatprep.mubr.msk.f32.mxu1 %vm4397_vm5, %v2381_v9  ;;  %vm4411_vm5 = vmmov %vm4379_vm0 }
 0x2f9   : > { %2578 = vmatmul.mubr.msk.f32.gmra.mrb[12].mxu1 %vm4398_vm9, %v2382_v11  ;;  %vm4412_vm9 = vmmov %vm4379_vm0 }
 0x2fa   : > { %2580 = vmatprep.mubr.msk.f32.mxu1 %vm4399_vm14, %v2383_v22  ;;  %vm4413_vm14 = vmmov %vm4379_vm0 }
 0x2fd   : > { %2581 = vmatmul.mubr.msk.f32.gmra.mrb[14].mxu1 %vm4400_vm7, %v2384_v54  ;;  %vm4414_vm7 = vmmov %vm4379_vm0 }
 0x3a4   : > { %v3862_v13 = vpop.f32.mrb[0].mxu1 }
 0x3a5   : > { %v3864_v17 = vpop.f32.mrb[1].mxu1 }
 0x3ae   : > { %v3866_v20 = vpop.f32.mrb[2].mxu1 }
 0x3af   : > { %v3868_v21 = vpop.f32.mrb[3].mxu1 }
 0x3b6   : > { %v3870_v14 = vpop.f32.mrb[4].mxu1 }
 0x3b7   : > { %v3872_v36 = vpop.f32.mrb[5].mxu1 }
 0x3bc   : > { %v3874_v37 = vpop.f32.mrb[6].mxu1 }
 0x3bd   : > { %v3876_v24 = vpop.f32.mrb[7].mxu1 }
 0x3c4   : > { %v2573_v39 = vpop.f32.mrb[8].mxu1 }
 0x3c5   : > { %v1551_v26 = vmul.f32 0.125, %v2573_v39  ;;  %v1511_v41 = vpop.f32.mrb[9].mxu1 }
 0x3c6   : > { %v1550_v43 = vmul.f32 0.125, %v1511_v41 }
 0x3c7   : > { %v3879_v34 = vadd.f32 %v1551_v26, %v3622_v3 }
 0x3c8   : > { %v2576_v47 = vpop.f32.mrb[10].mxu1  ;;  %v3882_v48 = vadd.f32 %v1550_v43, %v3618_v0 }
 0x3c9   : > { %v1553_v50 = vmul.f32 0.125, %v2576_v47  ;;  %v1521_v58 = vpop.f32.mrb[11].mxu1  ;;  %v1578_v63 = vsel %vm4401_vm8, %v3879_v34, -inf  ;;  %vm4415_vm8 = vmmov %vm4379_vm0 }
 0x3ca   : > { %v1552_v1 = vmul.f32 0.125, %v1521_v58  ;;  %1579 = vmax.xlane.f32.xlu0 %v1578_v63  ;;  %v1575_v5 = vsel %vm4402_vm1, %v3882_v48, -inf  ;;  %vm4430_vm1 = vmmov %vm4379_vm0 }
 0x3cb   : > { %1576 = vmax.xlane.f32.xlu1 %v1575_v5  ;;  %v3889_v9 = vadd.f32 %v1553_v50, %v3646_v12 }
 0x3cc   : > { %v2579_v3 = vpop.f32.mrb[12].mxu1  ;;  %v3892_v11 = vadd.f32 %v1552_v1, %v3635_v7 }
 0x3cd   : > { %v1555_v0 = vmul.f32 0.125, %v2579_v3  ;;  %v1531_v22 = vpop.f32.mrb[13].mxu1  ;;  %v1584_v54 = vsel %vm4403_vm3, %v3889_v9, -inf  ;;  %v3918_v3 = vld [vmem:[#allocation2 + $0x48] sm:$0xff]  ;;  %vm4431_vm3 = vmmov %vm4379_vm0 }
 0x3ce   : > { %v1554_v39 = vmul.f32 0.125, %v1531_v22  ;;  %v1581_v26 = vsel %vm4404_vm12, %v3892_v11, -inf  ;;  %vm4432_vm12 = vmmov %vm4379_vm0 }
 0x3cf   : > { %1585 = vmax.xlane.f32.xlu1 %v1584_v54  ;;  %1582 = vmax.xlane.f32.xlu0 %v1581_v26  ;;  %v3899_v41 = vadd.f32 %v1555_v0, %v3653_v18  ;;  %v3920_v0 = vld [vmem:[#allocation2 + $0x40] sm:$0xff]  ;;  %v2394_v26 = vld [vmem:[%s3383_s15 + $0x48] sm:$0xff] }
 0x3d0   : > { %v2582_v12 = vpop.f32.mrb[14].mxu1  ;;  %v3902_v43 = vadd.f32 %v1554_v39, %v3655_v19  ;;  %v2393_v39 = vld [vmem:[%s3383_s15 + $0x40] sm:$0xff] }
 0x3d1   : > { %v1557_v7 = vmul.f32 0.125, %v2582_v12  ;;  %v1541_v47 = vpop.f32.mrb[15].mxu1  ;;  %v1590_v50 = vsel %vm4405_vm13, %v3899_v41, -inf  ;;  %vm4433_vm13 = vmmov %vm4379_vm0 }
 0x3d2   : > { %v1556_v58 = vmul.f32 0.125, %v1541_v47  ;;  %v1587_v63 = vsel %vm4406_vm6, %v3902_v43, -inf  ;;  %v3937_v47 = vld [vmem:[#allocation2 + $0x50] sm:$0xff]  ;;  %vm4434_vm6 = vmmov %vm4379_vm0 }
 0x3d3   : > { %1591 = vmax.xlane.f32.xlu1 %v1590_v50  ;;  %1588 = vmax.xlane.f32.xlu0 %v1587_v63  ;;  %v3909_v18 = vadd.f32 %v1557_v7, %v3676_v30  ;;  %v3935_v7 = vld [vmem:[#allocation2 + $0x58] sm:$0xff]  ;;  %v2675_v50 = vpack.c.bf16 %v2394_v26, %v2393_v39  ;;  %v3952_v26 = vld [vmem:[#allocation2 + $0x68] sm:$0xff] }
 0x3d4   : > { %v3912_v1 = vadd.f32 %v1556_v58, %v3674_v29  ;;  %v2396_v39 = vld [vmem:[%s3383_s15 + $0x58] sm:$0xff]  ;;  %v3954_v58 = vld [vmem:[#allocation2 + $0x60] sm:$0xff] }
 0x3d5   : > { %v1596_v19 = vsel %vm4379_vm0, %v3909_v18, -inf  ;;  %2676 = vmatprep.subr.bf16.mxu0 %v2675_v50 }
 0x3d6   : > { %v1593_v5 = vsel %vm4407_vm10, %v3912_v1, -inf  ;;  %2678 = vmatpush3.bf16.msra.mxu0 %v2675_v50  ;;  %vm4435_vm10 = vmmov %vm4379_vm0 }
 0x3d7   : > { %1597 = vmax.xlane.f32.xlu1 %v1596_v19  ;;  %1594 = vmax.xlane.f32.xlu0 %v1593_v5 }
 0x457   : > { %v1580_v22 = vpop.xlane.xlu0 %1579 }
 0x458   : > { %v3923_v54 = vmax.f32 %v3918_v3, %v1580_v22  ;;  %v1577_v30 = vpop.xlane.xlu1 %1576 }
 0x459   : > { %v3926_v29 = vmax.f32 %v3920_v0, %v1577_v30  ;;  %v2395_v30 = vld [vmem:[%s3383_s15 + $0x50] sm:$0xff] }
 0x45a   : > { %1955 = vst.msk [vmem:[#allocation2 + $0x48] sm:$0xff] %vm1152_vm15, %v3923_v54  ;;  %1638 = vperm.xlu1 %2821, %v3923_v54   ;;  %v2679_v12 = vpack.c.bf16 %v2396_v39, %v2395_v30 }
 0x45b   : > { %1954 = vst.msk [vmem:[#allocation2 + $0x40] sm:$0xff] %vm1152_vm15, %v3926_v29  ;;  %1633 = vperm.xlu0 %2820, %v3926_v29  }
 0x45c   : > { %v1586_v63 = vpop.xlane.xlu1 %1585  ;;  %v1583_v19 = vpop.xlane.xlu0 %1582  ;;  %2680 = vmatprep.subr.bf16.mxu0 %v2679_v12 }
 0x45d   : > { %v3945_v5 = vmax.f32 %v3935_v7, %v1586_v63  ;;  %v3948_v22 = vmax.f32 %v3937_v47, %v1583_v19  ;;  %2682 = vmatpush3.bf16.msra.mxu0 %v2679_v12  ;;  %v3974_v63 = vld [vmem:[#allocation2 + $0x78] sm:$0xff] }
 0x45e   : > { %2684 = vmatprep.subr.bf16.mxu0 %v2683_v16 }
 0x45f   : > { %1957 = vst.msk [vmem:[#allocation2 + $0x58] sm:$0xff] %vm1152_vm15, %v3945_v5  ;;  %1956 = vst.msk [vmem:[#allocation2 + $0x50] sm:$0xff] %vm1152_vm15, %v3948_v22  ;;  %1643 = vperm.xlu1 %2821, %v3948_v22   ;;  %1648 = vperm.xlu0 %2820, %v3945_v5  }
 0x460   : > { %v1592_v50 = vpop.xlane.xlu1 %1591  ;;  %v1589_v19 = vpop.xlane.xlu0 %1588 }
 0x461   : > { %v3967_v30 = vmax.f32 %v3952_v26, %v1592_v50  ;;  %v3970_v39 = vmax.f32 %v3954_v58, %v1589_v19  ;;  %2686 = vmatpush3.bf16.msra.mxu0 %v2683_v16  ;;  %v2687_v50 = vpack.c.bf16 %v2400_v60, %v2399_v15  ;;  %v1123_v60 = vsel %vm4408_vm4, %v3796_v10, 0.0  ;;  %vm4436_vm4 = vmmov %vm4379_vm0 }
 0x462   : > { %v1126_v15 = vsel %vm4409_vm11, %v3809_v40, 0.0  ;;  %v1120_v16 = vsel %vm4410_vm2, %v3790_v59, 0.0  ;;  %v1138_v10 = vsel %vm4413_vm14, %v3836_v52, 0.0  ;;  %v1135_v40 = vsel %vm4414_vm7, %v3828_v35, 0.0  ;;  %vm4437_vm11 = vmmov %vm4379_vm0 }
 0x463   : > { %1959 = vst.msk [vmem:[#allocation2 + $0x68] sm:$0xff] %vm1152_vm15, %v3967_v30  ;;  %1958 = vst.msk [vmem:[#allocation2 + $0x60] sm:$0xff] %vm1152_vm15, %v3970_v39  ;;  %1653 = vperm.xlu1 %2821, %v3970_v39   ;;  %1658 = vperm.xlu0 %2820, %v3967_v30   ;;  %v1141_v59 = vsel %vm4415_vm8, %v3841_v62, 0.0  ;;  %v4418_v52 = vsub.f32 %v3703_v46, %v3713_v53  ;;  %v4419_v35 = vsub.f32 %v3718_v56, %v3734_v2 }
 0x464   : > { %v1598_v12 = vpop.xlane.xlu1 %1597  ;;  %v1595_v19 = vpop.xlane.xlu0 %1594  ;;  %2688 = vmatprep.subr.bf16.mxu0 %v2687_v50  ;;  %v4420_v62 = vsub.f32 %v3720_v57, %v3739_v6  ;;  %v4422_v46 = vsub.f32 %v3741_v8, %v3758_v25  ;;  %v4424_v57 = vsub.f32 %v3918_v3, %v3923_v54  ;;  %v4425_v6 = vsub.f32 %v3920_v0, %v3926_v29  ;;  %vm4438_vm2 = vmmov %vm4379_vm0 }
 0x465   : > { %v3989_v31 = vmax.f32 %v3974_v63, %v1598_v12  ;;  %v3992_v33 = vmax.f32 %v3976_v28, %v1595_v19  ;;  %2690 = vmatpush3.bf16.msra.mxu0 %v2687_v50  ;;  %v1132_v12 = vsel %vm4411_vm5, %v3824_v51, 0.0  ;;  %v1129_v19 = vsel %vm4412_vm9, %v3813_v38, 0.0  ;;  %vm4439_vm5 = vmmov %vm4379_vm0 }
 0x466   : > { %v4416_v51 = vsub.f32 %v3696_v42, %v3699_v44  ;;  %v4417_v38 = vsub.f32 %v3701_v45, %v3716_v55  ;;  %v1032_v42 = vmul.f32 1.442695, %v4420_v62  ;;  %v4421_v44 = vsub.f32 %v3736_v4, %v3755_v23  ;;  %vm4440_vm9 = vmmov %vm4379_vm0 }
 0x467   : > { %v1614_v61 = vsub.f32 %v3974_v63, %v3989_v31  ;;  %1961 = vst.msk [vmem:[#allocation2 + $0x78] sm:$0xff] %vm1152_vm15, %v3989_v31  ;;  %v1613_v49 = vsub.f32 %v3976_v28, %v3992_v33  ;;  %1960 = vst.msk [vmem:[#allocation2 + $0x70] sm:$0xff] %vm1152_vm15, %v3992_v33  ;;  %1668 = vperm.xlu0 %2820, %v3989_v31   ;;  %1663 = vperm.xlu1 %2821, %v3992_v33   ;;  %v1036_v53 = vmul.f32 1.442695, %v4422_v46  ;;  %v1106_v28 = vld [vmem:[#allocation3 + $0x10] sm:$0xff]  ;;  %v1104_v33 = vld [vmem:[#allocation3] sm:$0xff] }
 0x468   : > { %v1024_v50 = vmul.f32 1.442695, %v4416_v51  ;;  %v1034_v45 = vmul.f32 1.442695, %v4421_v44  ;;  %v4423_v55 = vsub.f32 %v3760_v27, %v3772_v32  ;;  %v1617_v4 = vmul.f32 1.442695, %v4424_v57  ;;  %vm4441_vm14 = vmmov %vm4379_vm0 }
 0x469   : > { %v1615_v8 = vmul.f32 1.442695, %v4425_v6  ;;  %v4426_v27 = vsub.f32 %v3935_v7, %v3945_v5  ;;  %v4427_v3 = vsub.f32 %v3937_v47, %v3948_v22  ;;  %v4429_v7 = vsub.f32 %v3954_v58, %v3970_v39  ;;  %vm4442_vm7 = vmmov %vm4379_vm0 }
 0x46a   : > { %2838 = vpow2.f32 %v1024_v50  ;;  %v1038_v56 = vmul.f32 1.442695, %v4423_v55  ;;  %vm4443_vm8 = vmmov %vm4379_vm0 }
 0x46b   : > { %v1621_v32 = vmul.f32 1.442695, %v4426_v27  ;;  %v1619_v54 = vmul.f32 1.442695, %v4427_v3  ;;  %v1623_v5 = vmul.f32 1.442695, %v4429_v7 }
 0x474   : > { %v4046_v2 = vpop.eup %2838 }
 0x475   : > { %v1112_v31 = vmul.f32 %v4046_v2, %v1104_v33 }
 0x486   : > { %1124 = vadd.xlane.f32.xlu0 %v1123_v60  ;;  %v1026_v60 = vmul.f32 1.442695, %v4417_v38 }
 0x488   : > { %2840 = vpow2.f32 %v1026_v60 }
 0x48a   : > { %1127 = vadd.xlane.f32.xlu0 %v1126_v15  ;;  %v1028_v15 = vmul.f32 1.442695, %v4418_v52 }
 0x48b   : > { %1121 = vadd.xlane.f32.xlu1 %v1120_v16  ;;  %v1030_v16 = vmul.f32 1.442695, %v4419_v35 }
 0x48c   : > { %2842 = vpow2.f32 %v1028_v15 }
 0x48d   : > { %2844 = vpow2.f32 %v1030_v16 }
 0x48e   : > { %1133 = vadd.xlane.f32.xlu0 %v1132_v12  ;;  %2846 = vpow2.f32 %v1032_v42 }
 0x48f   : > { %1130 = vadd.xlane.f32.xlu1 %v1129_v19  ;;  %2848 = vpow2.f32 %v1034_v45  ;;  %v4428_v19 = vsub.f32 %v3952_v26, %v3967_v30 }
 0x490   : > { %2850 = vpow2.f32 %v1036_v53 }
 0x491   : > { %2852 = vpow2.f32 %v1038_v56 }
 0x492   : > { %1139 = vadd.xlane.f32.xlu0 %v1138_v10  ;;  %v4048_v12 = vpop.eup %2840  ;;  %2854 = vpow2.f32 %v1617_v4  ;;  %v1625_v10 = vmul.f32 1.442695, %v4428_v19 }
 0x493   : > { %1136 = vadd.xlane.f32.xlu1 %v1135_v40  ;;  %2856 = vpow2.f32 %v1615_v8 }
 0x494   : > { %2858 = vpow2.f32 %v1621_v32 }
 0x495   : > { %2860 = vpow2.f32 %v1619_v54 }
 0x496   : > { %v4058_v23 = vpop.eup %2842  ;;  %2862 = vpow2.f32 %v1625_v10 }
 0x497   : > { %1142 = vadd.xlane.f32.xlu1 %v1141_v59  ;;  %v4060_v25 = vpop.eup %2844  ;;  %2864 = vpow2.f32 %v1623_v5 }
 0x498   : > { %v4070_v0 = vpop.eup %2846 }
 0x499   : > { %v4072_v29 = vpop.eup %2848 }
 0x49a   : > { %v4082_v47 = vpop.eup %2850 }
 0x49b   : > { %v4084_v22 = vpop.eup %2852 }
 0x49c   : > { %v4088_v26 = vpop.eup %2854 }
 0x49d   : > { %v4090_v30 = vpop.eup %2856 }
 0x49e   : > { %v4094_v58 = vpop.eup %2858 }
 0x49f   : > { %v4096_v39 = vpop.eup %2860 }
 0x4a0   : > { %v4100_v40 = vpop.eup %2862 }
 0x4a1   : > { %v4102_v59 = vpop.eup %2864 }
 0x4a8   : > { %1171 = vperm.xlu0 %2820, %v4046_v2   ;;  %1176 = vperm.xlu1 %2821, %v4048_v12  }
 0x4ac   : > { %1186 = vperm.xlu0 %2820, %v4060_v25   ;;  %1181 = vperm.xlu1 %2821, %v4058_v23  }
 0x4b0   : > { %1196 = vperm.xlu0 %2820, %v4072_v29   ;;  %1191 = vperm.xlu1 %2821, %v4070_v0  }
 0x4b4   : > { %1206 = vperm.xlu0 %2820, %v4084_v22   ;;  %1201 = vperm.xlu1 %2821, %v4082_v47  }
 0x4b8   : > { %1763 = vperm.xlu0 %2820, %v4090_v30   ;;  %1768 = vperm.xlu1 %2821, %v4088_v26  }
 0x4bc   : > { %1778 = vperm.xlu0 %2820, %v4094_v58   ;;  %1773 = vperm.xlu1 %2821, %v4096_v39  }
 0x4c0   : > { %1788 = vperm.xlu0 %2820, %v4100_v40   ;;  %1783 = vperm.xlu1 %2821, %v4102_v59  }
 0x4d9   : > { %v1639_v51 = vpop.permute.xlu1 %1638 }
 0x4da   : > { %v1672_v50 = vsub.f32 %v3879_v34, %v1639_v51  ;;  %v1634_v38 = vpop.permute.xlu0 %1633 }
 0x4db   : > { %v1671_v60 = vsub.f32 %v3882_v48, %v1634_v38 }
 0x4dc   : > { %v1681_v52 = vmul.f32 1.442695, %v1672_v50 }
 0x4dd   : > { %v1679_v15 = vmul.f32 1.442695, %v1671_v60 }
 0x4de   : > { %2866 = vpow2.f32 %v1681_v52  ;;  %v1644_v35 = vpop.permute.xlu1 %1643  ;;  %v1649_v16 = vpop.permute.xlu0 %1648  ;;  %v1627_v52 = vmul.f32 1.442695, %v1613_v49 }
 0x4df   : > { %2868 = vpow2.f32 %v1679_v15  ;;  %v1673_v62 = vsub.f32 %v3892_v11, %v1644_v35  ;;  %v1674_v42 = vsub.f32 %v3889_v9, %v1649_v16  ;;  %v1629_v15 = vmul.f32 1.442695, %v1614_v61 }
 0x4e0   : > { %v1114_v61 = vmul.f32 %v4058_v23, %v1106_v28 }
 0x4e1   : > { %v1683_v44 = vmul.f32 1.442695, %v1673_v62  ;;  %v1685_v45 = vmul.f32 1.442695, %v1674_v42  ;;  %v1105_v62 = vld [vmem:[#allocation3 + $0x8] sm:$0xff] }
 0x4e2   : > { %v1654_v46 = vpop.permute.xlu1 %1653  ;;  %v1659_v53 = vpop.permute.xlu0 %1658  ;;  %v1113_v42 = vmul.f32 %v4048_v12, %v1105_v62  ;;  %v1165_v62 = vld [vmem:[#allocation4 + $0x20] sm:$0xff] }
 0x4e3   : > { %2870 = vpow2.f32 %v1683_v44  ;;  %v1675_v34 = vsub.f32 %v3902_v43, %v1654_v46  ;;  %v1676_v55 = vsub.f32 %v3899_v41, %v1659_v53 }
 0x4e4   : > { %2872 = vpow2.f32 %v1685_v45  ;;  %v1108_v45 = vld [vmem:[#allocation3 + $0x20] sm:$0xff] }
 0x4e5   : > { %v1687_v48 = vmul.f32 1.442695, %v1675_v34  ;;  %v1689_v56 = vmul.f32 1.442695, %v1676_v55  ;;  %v1107_v34 = vld [vmem:[#allocation3 + $0x18] sm:$0xff]  ;;  %v1116_v12 = vmul.f32 %v4070_v0, %v1108_v45 }
 0x4e6   : > { %v1664_v57 = vpop.permute.xlu1 %1663  ;;  %v1669_v4 = vpop.permute.xlu0 %1668 }
 0x4e7   : > { %2874 = vpow2.f32 %v1687_v48  ;;  %v1677_v6 = vsub.f32 %v3912_v1, %v1664_v57  ;;  %v1678_v11 = vsub.f32 %v3909_v18, %v1669_v4  ;;  %v1110_v57 = vld [vmem:[#allocation3 + $0x30] sm:$0xff] }
 0x4e8   : > { %v2867_v9 = vpop.eup %2866  ;;  %2876 = vpow2.f32 %v1689_v56  ;;  %v1115_v56 = vmul.f32 %v4060_v25, %v1107_v34  ;;  %v1118_v2 = vmul.f32 %v4082_v47, %v1110_v57  ;;  %v1696_v57 = vld [vmem:[#allocation3 + $0x40] sm:$0xff] }
 0x4e9   : > { %v2869_v8 = vpop.eup %2868  ;;  %v1691_v27 = vmul.f32 1.442695, %v1677_v6  ;;  %v1693_v32 = vmul.f32 1.442695, %v1678_v11  ;;  %v1715_v3 = vsel %vm4430_vm1, %v2867_v9, 0.0  ;;  %vm4444_vm1 = vmmov %vm4379_vm0  ;;  %v1109_v6 = vld [vmem:[#allocation3 + $0x28] sm:$0xff] }
 0x4ea   : > { %1716 = vadd.xlane.f32.xlu0 %v1715_v3  ;;  %2599 = vmatprep.mubr.msk.f32.mxu0 %vm4431_vm3, %v2869_v8  ;;  %v1712_v41 = vsel %vm4432_vm12, %v2869_v8, 0.0  ;;  %v1117_v8 = vmul.f32 %v4072_v29, %v1109_v6  ;;  %vm4445_vm3 = vmmov %vm4379_vm0  ;;  %v1704_v6 = vmul.f32 %v4090_v30, %v1696_v57 }
 0x4eb   : > { %2878 = vpow2.f32 %v1691_v27  ;;  %2600 = vmatmul.mubr.msk.f32.vlgmr.msra.gmra.mrb[8].mxu0 %vm4433_vm13, %v2867_v9  ;;  %1713 = vadd.xlane.f32.xlu1 %v1712_v41  ;;  %vm4446_vm12 = vmmov %vm4379_vm0 }
 0x4ec   : > { %2880 = vpow2.f32 %v1693_v32  ;;  %v1111_v32 = vld [vmem:[#allocation3 + $0x38] sm:$0xff]  ;;  %vm4447_vm13 = vmmov %vm4379_vm0 }
 0x4ed   : > { %v2871_v43 = vpop.eup %2870  ;;  %2882 = vpow2.f32 %v1627_v52  ;;  %v1119_v25 = vmul.f32 %v4084_v22, %v1111_v32  ;;  %v1166_v52 = vld [vmem:[#allocation4 + $0x28] sm:$0xff]  ;;  %v1700_v32 = vld [vmem:[#allocation3 + $0x60] sm:$0xff] }
 0x4ee   : > { %v2873_v1 = vpop.eup %2872  ;;  %2602 = vmatprep.mubr.msk.f32.mxu0 %vm4434_vm6, %v2871_v43  ;;  %v1718_v18 = vsel %vm4379_vm0, %v2871_v43, 0.0  ;;  %2884 = vpow2.f32 %v1629_v15  ;;  %vm4448_vm6 = vmmov %vm4379_vm0  ;;  %v1708_v30 = vmul.f32 %v4102_v59, %v1700_v32 }
 0x4ef   : > { %1719 = vadd.xlane.f32.xlu0 %v1718_v18  ;;  %2603 = vmatmul.mubr.msk.f32.gmra.mrb[10].mxu0 %vm4435_vm10, %v2873_v1  ;;  %v1721_v54 = vsel %vm4436_vm4, %v2873_v1, 0.0  ;;  %v1161_v1 = vld [vmem:[#allocation4] sm:$0xff]  ;;  %v1162_v18 = vld [vmem:[#allocation4 + $0x8] sm:$0xff]  ;;  %vm4449_vm10 = vmmov %vm4379_vm0 }
 0x4f0   : > { %1722 = vadd.xlane.f32.xlu1 %v1721_v54  ;;  %vm4450_vm4 = vmmov %vm4379_vm0 }
 0x4f1   : > { %v2875_v19 = vpop.eup %2874 }
 0x4f2   : > { %v2877_v10 = vpop.eup %2876  ;;  %2605 = vmatprep.mubr.msk.f32.mxu0 %vm4437_vm11, %v2875_v19  ;;  %v1724_v7 = vsel %vm4438_vm2, %v2875_v19, 0.0  ;;  %vm4451_vm11 = vmmov %vm4379_vm0 }
 0x4f3   : > { %1725 = vadd.xlane.f32.xlu0 %v1724_v7  ;;  %2606 = vmatmul.mubr.msk.f32.gmra.mrb[12].mxu0 %vm4439_vm5, %v2877_v10  ;;  %v1727_v5 = vsel %vm4440_vm9, %v2877_v10, 0.0  ;;  %v1164_v10 = vld [vmem:[#allocation4 + $0x18] sm:$0xff]  ;;  %vm4452_vm2 = vmmov %vm4379_vm0 }
 0x4f4   : > { %1728 = vadd.xlane.f32.xlu1 %v1727_v5  ;;  %v1163_v5 = vld [vmem:[#allocation4 + $0x10] sm:$0xff]  ;;  %vm4453_vm5 = vmmov %vm4379_vm0 }
 0x4f5   : > { %v2879_v51 = vpop.eup %2878  ;;  %vm4455_vm9 = vmmov %vm4379_vm0 }
 0x4f6   : > { %v2881_v50 = vpop.eup %2880  ;;  %2608 = vmatprep.mubr.msk.f32.mxu0 %vm4441_vm14, %v2879_v51  ;;  %v1730_v38 = vsel %vm4442_vm7, %v2879_v51, 0.0  ;;  %vm4456_vm14 = vmmov %vm4379_vm0 }
 0x4f7   : > { %1731 = vadd.xlane.f32.xlu0 %v1730_v38  ;;  %2609 = vmatmul.mubr.msk.f32.gmra.mrb[14].mxu0 %vm4443_vm8, %v2881_v50  ;;  %v1733_v60 = vsel %vm4444_vm1, %v2881_v50, 0.0  ;;  %v4136_v35 = vpop.eup %2882  ;;  %vm4457_vm7 = vmmov %vm4379_vm0 }
 0x4f8   : > { %1734 = vadd.xlane.f32.xlu1 %v1733_v60  ;;  %v4139_v16 = vpop.eup %2884  ;;  %vm4458_vm8 = vmmov %vm4379_vm0 }
 0x4f9   : > { %vm4459_vm1 = vmmov %vm4379_vm0 }
 0x509   : > { %1793 = vperm.xlu1 %2821, %v4136_v35  }
 0x50d   : > { %1798 = vperm.xlu0 %2820, %v4139_v16  }
 0x513   : > { %v1125_v44 = vpop.xlane.xlu0 %1124 }
 0x514   : > { %v1145_v49 = vadd.f32 %v1125_v44, %v1113_v42 }
 0x516   : > { %1154 = vst.msk [vmem:[#allocation3 + $0x8] sm:$0xff] %vm1152_vm15, %v1145_v49  ;;  %v1168_v49 = vld [vmem:[#allocation4 + $0x38] sm:$0xff] }
 0x517   : > { %v1128_v63 = vpop.xlane.xlu0 %1127 }
 0x518   : > { %v1146_v46 = vadd.f32 %v1128_v63, %v1114_v61  ;;  %v1122_v53 = vpop.xlane.xlu1 %1121  ;;  %v1167_v61 = vld [vmem:[#allocation4 + $0x30] sm:$0xff] }
 0x519   : > { %v1144_v55 = vadd.f32 %v1122_v53, %v1112_v31 }
 0x51a   : > { %1155 = vst.msk [vmem:[#allocation3 + $0x10] sm:$0xff] %vm1152_vm15, %v1146_v46 }
 0x51b   : > { %1153 = vst.msk [vmem:[#allocation3] sm:$0xff] %vm1152_vm15, %v1144_v55  ;;  %v1134_v48 = vpop.xlane.xlu0 %1133 }
 0x51c   : > { %v1148_v4 = vadd.f32 %v1134_v48, %v1116_v12  ;;  %v1131_v23 = vpop.xlane.xlu1 %1130  ;;  %v1697_v48 = vld [vmem:[#allocation3 + $0x48] sm:$0xff] }
 0x51d   : > { %v1147_v11 = vadd.f32 %v1131_v23, %v1115_v56 }
 0x51e   : > { %1157 = vst.msk [vmem:[#allocation3 + $0x20] sm:$0xff] %vm1152_vm15, %v1148_v4  ;;  %v1705_v4 = vmul.f32 %v4088_v26, %v1697_v48 }
 0x51f   : > { %1156 = vst.msk [vmem:[#allocation3 + $0x18] sm:$0xff] %vm1152_vm15, %v1147_v11  ;;  %v1140_v9 = vpop.xlane.xlu0 %1139 }
 0x520   : > { %v1150_v0 = vadd.f32 %v1140_v9, %v1118_v2  ;;  %v1137_v27 = vpop.xlane.xlu1 %1136  ;;  %v1699_v9 = vld [vmem:[#allocation3 + $0x58] sm:$0xff] }
 0x521   : > { %v1149_v3 = vadd.f32 %v1137_v27, %v1117_v8  ;;  %v1707_v27 = vmul.f32 %v4094_v58, %v1699_v9 }
 0x522   : > { %1159 = vst.msk [vmem:[#allocation3 + $0x30] sm:$0xff] %vm1152_vm15, %v1150_v0 }
 0x523   : > { %1158 = vst.msk [vmem:[#allocation3 + $0x28] sm:$0xff] %vm1152_vm15, %v1149_v3 }
 0x524   : > { %v1143_v41 = vpop.xlane.xlu1 %1142 }
 0x525   : > { %v1151_v43 = vadd.f32 %v1143_v41, %v1119_v25  ;;  %v1701_v25 = vld [vmem:[#allocation3 + $0x68] sm:$0xff] }
 0x527   : > { %1160 = vst.msk [vmem:[#allocation3 + $0x38] sm:$0xff] %vm1152_vm15, %v1151_v43  ;;  %v1172_v47 = vpop.permute.xlu0 %1171 }
 0x528   : > { %v1209_v54 = vmul.f32 %v1172_v47, %v1161_v1  ;;  %v1177_v19 = vpop.permute.xlu1 %1176  ;;  %v1709_v1 = vmul.f32 %v4100_v40, %v1701_v25  ;;  %v1754_v40 = vld [vmem:[#allocation4 + $0x48] sm:$0xff] }
 0x529   : > { %v1210_v29 = vmul.f32 %v1177_v19, %v1162_v18  ;;  %v1702_v18 = vld [vmem:[#allocation3 + $0x70] sm:$0xff] }
 0x52a   : > { %v1346_v7 = vadd.f32 %v3864_v17, %v1209_v54  ;;  %v1703_v54 = vld [vmem:[#allocation3 + $0x78] sm:$0xff]  ;;  %v1710_v58 = vmul.f32 %v4136_v35, %v1702_v18 }
 0x52b   : > { %v1347_v51 = vadd.f32 %v3862_v13, %v1210_v29  ;;  %v1187_v50 = vpop.permute.xlu0 %1186 }
 0x52c   : > { %1354 = vst.msk [vmem:[#allocation4] sm:$0xff] %vm4445_vm3, %v1346_v7  ;;  %v1212_v22 = vmul.f32 %v1187_v50, %v1164_v10  ;;  %v1182_v38 = vpop.permute.xlu1 %1181  ;;  %v1711_v10 = vmul.f32 %v4139_v16, %v1703_v54 }
 0x52d   : > { %1355 = vst.msk [vmem:[#allocation4 + $0x8] sm:$0xff] %vm4446_vm12, %v1347_v51  ;;  %v1211_v60 = vmul.f32 %v1182_v38, %v1163_v5  ;;  %v1753_v51 = vld [vmem:[#allocation4 + $0x40] sm:$0xff]  ;;  %v1756_v38 = vld [vmem:[#allocation4 + $0x58] sm:$0xff] }
 0x52e   : > { %v1349_v15 = vadd.f32 %v3866_v20, %v1212_v22 }
 0x52f   : > { %v1348_v42 = vadd.f32 %v3868_v21, %v1211_v60  ;;  %v1197_v44 = vpop.permute.xlu0 %1196 }
 0x530   : > { %1357 = vst.msk [vmem:[#allocation4 + $0x18] sm:$0xff] %vm4447_vm13, %v1349_v15  ;;  %v1214_v17 = vmul.f32 %v1197_v44, %v1166_v52  ;;  %v1192_v28 = vpop.permute.xlu1 %1191  ;;  %v1755_v52 = vld [vmem:[#allocation4 + $0x50] sm:$0xff]  ;;  %v1758_v44 = vld [vmem:[#allocation4 + $0x68] sm:$0xff] }
 0x531   : > { %1356 = vst.msk [vmem:[#allocation4 + $0x10] sm:$0xff] %vm4448_vm6, %v1348_v42  ;;  %v1213_v13 = vmul.f32 %v1192_v28, %v1165_v62  ;;  %v1757_v28 = vld [vmem:[#allocation4 + $0x60] sm:$0xff] }
 0x532   : > { %v1351_v33 = vadd.f32 %v3870_v14, %v1214_v17 }
 0x533   : > { %v1350_v63 = vadd.f32 %v3872_v36, %v1213_v13  ;;  %v1207_v31 = vpop.permute.xlu0 %1206 }
 0x534   : > { %1359 = vst.msk [vmem:[#allocation4 + $0x28] sm:$0xff] %vm4379_vm0, %v1351_v33  ;;  %v1216_v20 = vmul.f32 %v1207_v31, %v1168_v49  ;;  %v1202_v45 = vpop.permute.xlu1 %1201  ;;  %v1760_v31 = vld [vmem:[#allocation4 + $0x78] sm:$0xff] }
 0x535   : > { %1358 = vst.msk [vmem:[#allocation4 + $0x20] sm:$0xff] %vm4449_vm10, %v1350_v63  ;;  %v1215_v21 = vmul.f32 %v1202_v45, %v1167_v61 }
 0x536   : > { %v1353_v46 = vadd.f32 %v3874_v37, %v1216_v20 }
 0x537   : > { %v1352_v53 = vadd.f32 %v3876_v24, %v1215_v21  ;;  %v1764_v14 = vpop.permute.xlu0 %1763  ;;  %v1698_v24 = vld [vmem:[#allocation3 + $0x50] sm:$0xff] }
 0x538   : > { %1361 = vst.msk [vmem:[#allocation4 + $0x38] sm:$0xff] %vm4450_vm4, %v1353_v46  ;;  %v1769_v34 = vpop.permute.xlu1 %1768  ;;  %v1706_v8 = vmul.f32 %v4096_v39, %v1698_v24  ;;  %v1801_v22 = vmul.f32 %v1764_v14, %v1753_v51  ;;  %v1759_v21 = vld [vmem:[#allocation4 + $0x70] sm:$0xff] }
 0x539   : > { %1360 = vst.msk [vmem:[#allocation4 + $0x30] sm:$0xff] %vm4451_vm11, %v1352_v53  ;;  %v1802_v50 = vmul.f32 %v1769_v34, %v1754_v40 }
 0x53b   : > { %v1779_v55 = vpop.permute.xlu0 %1778 }
 0x53c   : > { %v1774_v36 = vpop.permute.xlu1 %1773  ;;  %v1804_v42 = vmul.f32 %v1779_v55, %v1756_v38 }
 0x53d   : > { %v1803_v16 = vmul.f32 %v1774_v36, %v1755_v52 }
 0x53f   : > { %v1789_v12 = vpop.permute.xlu0 %1788 }
 0x540   : > { %v1784_v56 = vpop.permute.xlu1 %1783  ;;  %v1806_v61 = vmul.f32 %v1789_v12, %v1758_v44 }
 0x541   : > { %v1805_v63 = vmul.f32 %v1784_v56, %v1757_v28 }
 0x577   : > { %v1717_v23 = vpop.xlane.xlu0 %1716 }
 0x578   : > { %v1737_v37 = vadd.f32 %v1717_v23, %v1705_v4  ;;  %v1714_v11 = vpop.xlane.xlu1 %1713 }
 0x579   : > { %v1736_v2 = vadd.f32 %v1714_v11, %v1704_v6 }
 0x57a   : > { %1745 = vst.msk [vmem:[#allocation3 + $0x48] sm:$0xff] %vm1152_vm15, %v1737_v37 }
 0x57b   : > { %1744 = vst.msk [vmem:[#allocation3 + $0x40] sm:$0xff] %vm1152_vm15, %v1736_v2 }
 0x57c   : > { %v1720_v0 = vpop.xlane.xlu0 %1719 }
 0x57d   : > { %v1738_v3 = vadd.f32 %v1720_v0, %v1706_v8  ;;  %v1723_v26 = vpop.xlane.xlu1 %1722 }
 0x57e   : > { %v1739_v41 = vadd.f32 %v1723_v26, %v1707_v27 }
 0x57f   : > { %1746 = vst.msk [vmem:[#allocation3 + $0x50] sm:$0xff] %vm1152_vm15, %v1738_v3 }
 0x580   : > { %1747 = vst.msk [vmem:[#allocation3 + $0x58] sm:$0xff] %vm1152_vm15, %v1739_v41  ;;  %v1726_v43 = vpop.xlane.xlu0 %1725 }
 0x581   : > { %v1740_v47 = vadd.f32 %v1726_v43, %v1708_v30  ;;  %v1729_v39 = vpop.xlane.xlu1 %1728 }
 0x582   : > { %v1741_v19 = vadd.f32 %v1729_v39, %v1709_v1 }
 0x583   : > { %1748 = vst.msk [vmem:[#allocation3 + $0x60] sm:$0xff] %vm1152_vm15, %v1740_v47 }
 0x584   : > { %1749 = vst.msk [vmem:[#allocation3 + $0x68] sm:$0xff] %vm1152_vm15, %v1741_v19  ;;  %v1732_v29 = vpop.xlane.xlu0 %1731 }
 0x585   : > { %v1742_v59 = vadd.f32 %v1732_v29, %v1710_v58  ;;  %v1735_v7 = vpop.xlane.xlu1 %1734 }
 0x586   : > { %v1743_v5 = vadd.f32 %v1735_v7, %v1711_v10 }
 0x587   : > { %1750 = vst.msk [vmem:[#allocation3 + $0x70] sm:$0xff] %vm1152_vm15, %v1742_v59 }
 0x588   : > { %1751 = vst.msk [vmem:[#allocation3 + $0x78] sm:$0xff] %vm1152_vm15, %v1743_v5  ;;  %vm4454_vm15 = vmmov %vm4379_vm0 }
 0x589   : > { %v1794_v46 = vpop.permute.xlu1 %1793 }
 0x58a   : > { %v1807_v36 = vmul.f32 %v1794_v46, %v1759_v21 }
 0x58c   : > { %v1799_v20 = vpop.permute.xlu0 %1798 }
 0x58d   : > { %v1808_v55 = vmul.f32 %v1799_v20, %v1760_v31 }
 0x5be   : > { %v2601_v60 = vpop.f32.mrb[8].mxu0 }
 0x5bf   : > { %v1939_v35 = vadd.f32 %v2601_v60, %v1802_v50  ;;  %v1899_v15 = vpop.f32.mrb[9].mxu0 }
 0x5c0   : > { %v1938_v62 = vadd.f32 %v1899_v15, %v1801_v22 }
 0x5c1   : > { %1947 = vst.msk [vmem:[#allocation4 + $0x48] sm:$0xff] %vm4452_vm2, %v1939_v35 }
 0x5c2   : > { %1946 = vst.msk [vmem:[#allocation4 + $0x40] sm:$0xff] %vm4453_vm5, %v1938_v62  ;;  %v2604_v17 = vpop.f32.mrb[10].mxu0 }
 0x5c3   : > { %v1941_v13 = vadd.f32 %v2604_v17, %v1804_v42  ;;  %v1909_v49 = vpop.f32.mrb[11].mxu0 }
 0x5c4   : > { %v1940_v33 = vadd.f32 %v1909_v49, %v1803_v16 }
 0x5c5   : > { %1949 = vst.msk [vmem:[#allocation4 + $0x58] sm:$0xff] %vm4454_vm15, %v1941_v13 }
 0x5c6   : > { %1948 = vst.msk [vmem:[#allocation4 + $0x50] sm:$0xff] %vm4455_vm9, %v1940_v33  ;;  %v2607_v45 = vpop.f32.mrb[12].mxu0 }
 0x5c7   : > { %v1943_v53 = vadd.f32 %v2607_v45, %v1806_v61  ;;  %v1919_v14 = vpop.f32.mrb[13].mxu0 }
 0x5c8   : > { %v1942_v34 = vadd.f32 %v1919_v14, %v1805_v63 }
 0x5c9   : > { %1951 = vst.msk [vmem:[#allocation4 + $0x68] sm:$0xff] %vm4456_vm14, %v1943_v53 }
 0x5ca   : > { %1950 = vst.msk [vmem:[#allocation4 + $0x60] sm:$0xff] %vm4457_vm7, %v1942_v34  ;;  %v2610_v12 = vpop.f32.mrb[14].mxu0 }
 0x5cb   : > { %v1945_v48 = vadd.f32 %v2610_v12, %v1808_v55  ;;  %v1929_v57 = vpop.f32.mrb[15].mxu0 }
 0x5cc   : > { %v1944_v56 = vadd.f32 %v1929_v57, %v1807_v36 }
 0x5cd   : > { %1953 = vst.msk [vmem:[#allocation4 + $0x78] sm:$0xff] %vm4458_vm8, %v1945_v48 }
 0x5ce   : > { %1952 = vst.msk [vmem:[#allocation4 + $0x70] sm:$0xff] %vm4459_vm1, %v1944_v56 }
 0x5cf PF: > { %s4460_s8 = sld [smem:[#allocation16_spill]] }
 0x5d5   : > { %p2425_p6 = scmp.ne.s32.totalorder %s4460_s8, 3 }
 0x5d6   : > { %v2050_v4 = vld [vmem:[#allocation3 + $0x50] sm:$0xff] (!%p2425_p6)  ;;  %v2048_v23 = vld [vmem:[#allocation3 + $0x40] sm:$0xff] (!%p2425_p6)  ;;  %v3096_v6 = vmov (!%p2425_p6), 0   ;;  %v2051_v37 = vld [vmem:[#allocation3 + $0x58] sm:$0xff] (!%p2425_p6)  ;;  %s3097_s11 = smov (!%p2425_p6), 64   ;;  %vm2144_vm3 = vcmask (!%p2425_p6), 523264  }
 0x5d7   : > { %1965 = sbr.rel (%p2425_p6) target bundleno = 1770 (0x6ea), region = 158  ;;  %2887 = vset.pattern.permute.xlu1 (!%p2425_p6), %v3096_v6  ;;  %2886 = vset.pattern.permute.xlu0 (!%p2425_p6), %v3096_v6  ;;  %v2049_v11 = vld [vmem:[#allocation3 + $0x48] sm:$0xff] (!%p2425_p6)  ;;  %v2052_v2 = vld [vmem:[#allocation3 + $0x60] sm:$0xff] (!%p2425_p6)  ;;  %v2055_v9 = vld [vmem:[#allocation3 + $0x78] sm:$0xff] (!%p2425_p6) }
 0x5d8   : > { %2068 = vperm.xlu1 (!%p2425_p6), %2887, %v2050_v4   ;;  %2058 = vperm.xlu0 (!%p2425_p6), %2886, %v2048_v23   ;;  %v2053_v24 = vld [vmem:[#allocation3 + $0x68] sm:$0xff] (!%p2425_p6)  ;;  %v2054_v8 = vld [vmem:[#allocation3 + $0x70] sm:$0xff] (!%p2425_p6)  ;;  %v1974_v27 = vld [vmem:[#allocation3] sm:$0xff] (!%p2425_p6) }
 0x5d9   : > { %v1975_v0 = vld [vmem:[#allocation3 + $0x8] sm:$0xff] (!%p2425_p6)  ;;  %v1977_v32 = vld [vmem:[#allocation3 + $0x18] sm:$0xff] (!%p2425_p6)  ;;  %v1976_v3 = vld [vmem:[#allocation3 + $0x10] sm:$0xff] (!%p2425_p6) }
 0x5da   : > { %v1979_v26 = vld [vmem:[#allocation3 + $0x28] sm:$0xff] (!%p2425_p6)  ;;  %v1978_v25 = vld [vmem:[#allocation3 + $0x20] sm:$0xff] (!%p2425_p6)  ;;  %v1981_v41 = vld [vmem:[#allocation3 + $0x38] sm:$0xff] (!%p2425_p6) }
 0x5db   : > { %v1980_v30 = vld [vmem:[#allocation3 + $0x30] sm:$0xff] (!%p2425_p6)  ;;  %v2039_v19 = vld [vmem:[#allocation4 + $0x40] sm:$0xff] (!%p2425_p6)  ;;  %v2040_v40 = vld [vmem:[#allocation4 + $0x48] sm:$0xff] (!%p2425_p6) }
 0x5dc   : > { %2073 = vperm.xlu1 (!%p2425_p6), %2887, %v2051_v37   ;;  %2063 = vperm.xlu0 (!%p2425_p6), %2886, %v2049_v11   ;;  %v2041_v59 = vld [vmem:[#allocation4 + $0x50] sm:$0xff] (!%p2425_p6)  ;;  %v2042_v60 = vld [vmem:[#allocation4 + $0x58] sm:$0xff] (!%p2425_p6)  ;;  %v2043_v52 = vld [vmem:[#allocation4 + $0x60] sm:$0xff] (!%p2425_p6) }
 0x5dd   : > { %v2044_v16 = vld [vmem:[#allocation4 + $0x68] sm:$0xff] (!%p2425_p6)  ;;  %v2045_v44 = vld [vmem:[#allocation4 + $0x70] sm:$0xff] (!%p2425_p6)  ;;  %v2046_v33 = vld [vmem:[#allocation4 + $0x78] sm:$0xff] (!%p2425_p6) }
 0x5de   : > { %v1966_v34 = vld [vmem:[#allocation4] sm:$0xff]  ;;  %v1967_v56 = vld [vmem:[#allocation4 + $0x8] sm:$0xff]  ;;  %v1968_v4 = vld [vmem:[#allocation4 + $0x10] sm:$0xff] }
 0x5e0   : > { %2083 = vperm.xlu1 %2887, %v2053_v24   ;;  %2078 = vperm.xlu0 %2886, %v2052_v2  }
 0x5e4   : > { %2093 = vperm.xlu1 %2887, %v2055_v9   ;;  %2088 = vperm.xlu0 %2886, %v2054_v8   ;;  %v1969_v8 = vld [vmem:[#allocation4 + $0x18] sm:$0xff] }
 0x5e8   : > { %1989 = vperm.xlu1 %2887, %v1975_v0   ;;  %1984 = vperm.xlu0 %2886, %v1974_v27   ;;  %v1970_v0 = vld [vmem:[#allocation4 + $0x20] sm:$0xff] }
 0x5ec   : > { %1999 = vperm.xlu1 %2887, %v1977_v32   ;;  %1994 = vperm.xlu0 %2886, %v1976_v3  }
 0x5f0   : > { %2009 = vperm.xlu1 %2887, %v1979_v26   ;;  %2004 = vperm.xlu0 %2886, %v1978_v25  }
 0x5f4   : > { %2019 = vperm.xlu1 %2887, %v1981_v41   ;;  %2014 = vperm.xlu0 %2886, %v1980_v30  }
 0x657   : > { %v2069_v43 = vpop.permute.xlu1 %2068  ;;  %v2059_v1 = vpop.permute.xlu0 %2058 }
 0x658   : > { %2888 = vrcp.f32 %v2069_v43 }
 0x659   : > { %2890 = vrcp.f32 %v2059_v1  ;;  %v1971_v1 = vld [vmem:[#allocation4 + $0x28] sm:$0xff] }
 0x65b   : > { %v2074_v18 = vpop.permute.xlu1 %2073  ;;  %v2064_v47 = vpop.permute.xlu0 %2063 }
 0x65c   : > { %2892 = vrcp.f32 %v2064_v47 }
 0x65d   : > { %2894 = vrcp.f32 %v2074_v18  ;;  %v1972_v18 = vld [vmem:[#allocation4 + $0x30] sm:$0xff] }
 0x65f   : > { %v2084_v39 = vpop.permute.xlu1 %2083  ;;  %v2079_v54 = vpop.permute.xlu0 %2078 }
 0x660   : > { %2896 = vrcp.f32 %v2079_v54 }
 0x661   : > { %2898 = vrcp.f32 %v2084_v39 }
 0x662   : > { %v2889_v58 = vpop.eup %2888 }
 0x663   : > { %v2891_v29 = vpop.eup %2890  ;;  %v2089_v10 = vpop.permute.xlu0 %2088  ;;  %v2101_v51 = vmul.f32 %v2889_v58, %v2041_v59  ;;  %v1973_v59 = vld [vmem:[#allocation4 + $0x38] sm:$0xff] }
 0x664   : > { %v2094_v7 = vpop.permute.xlu1 %2093  ;;  %v2097_v5 = vmul.f32 %v2891_v29, %v2039_v19  ;;  %2900 = vrcp.f32 %v2089_v10 }
 0x665   : > { %2902 = vrcp.f32 %v2094_v7 }
 0x666   : > { %2120 = vrot.lane.b32.xlu0 %v2097_v5, %s3097_s11  ;;  %v2893_v50 = vpop.eup %2892 }
 0x667   : > { %v2099_v22 = vmul.f32 %v2893_v50, %v2040_v40  ;;  %v2895_v38 = vpop.eup %2894  ;;  %v1985_v63 = vpop.permute.xlu0 %1984 }
 0x668   : > { %v2103_v15 = vmul.f32 %v2895_v38, %v2042_v60  ;;  %v1990_v31 = vpop.permute.xlu1 %1989  ;;  %2904 = vrcp.f32 %v1985_v63 }
 0x669   : > { %2122 = vrot.lane.b32.xlu1 %v2099_v22, %s3097_s11  ;;  %2906 = vrcp.f32 %v1990_v31 }
 0x66a   : > { %2124 = vrot.lane.b32.xlu0 %v2101_v51, %s3097_s11  ;;  %v2897_v35 = vpop.eup %2896 }
 0x66b   : > { %v2105_v62 = vmul.f32 %v2897_v35, %v2043_v52  ;;  %v2899_v42 = vpop.eup %2898  ;;  %v1995_v20 = vpop.permute.xlu0 %1994 }
 0x66c   : > { %v2107_v28 = vmul.f32 %v2899_v42, %v2044_v16  ;;  %v2000_v45 = vpop.permute.xlu1 %1999  ;;  %2908 = vrcp.f32 %v1995_v20 }
 0x66d   : > { %2126 = vrot.lane.b32.xlu1 %v2103_v15, %s3097_s11  ;;  %2910 = vrcp.f32 %v2000_v45 }
 0x66e   : > { %2128 = vrot.lane.b32.xlu0 %v2105_v62, %s3097_s11  ;;  %v2901_v17 = vpop.eup %2900 }
 0x66f   : > { %v2109_v13 = vmul.f32 %v2901_v17, %v2045_v44  ;;  %v2903_v49 = vpop.eup %2902  ;;  %v2005_v21 = vpop.permute.xlu0 %2004 }
 0x670   : > { %v2111_v61 = vmul.f32 %v2903_v49, %v2046_v33  ;;  %v2010_v46 = vpop.permute.xlu1 %2009  ;;  %2912 = vrcp.f32 %v2005_v21 }
 0x671   : > { %2130 = vrot.lane.b32.xlu1 %v2107_v28, %s3097_s11  ;;  %2914 = vrcp.f32 %v2010_v46 }
 0x672   : > { %2132 = vrot.lane.b32.xlu0 %v2109_v13, %s3097_s11  ;;  %v2905_v14 = vpop.eup %2904 }
 0x673   : > { %v2015_v53 = vpop.permute.xlu0 %2014  ;;  %v2907_v55 = vpop.eup %2906  ;;  %v2023_v12 = vmul.f32 %v2905_v14, %v1966_v34 }
 0x674   : > { %2916 = vrcp.f32 %v2015_v53  ;;  %v2020_v36 = vpop.permute.xlu1 %2019  ;;  %v2025_v37 = vmul.f32 %v2907_v55, %v1967_v56 }
 0x675   : > { %2134 = vrot.lane.b32.xlu1 %v2111_v61, %s3097_s11  ;;  %2918 = vrcp.f32 %v2020_v36 }
 0x676   : > { %v2909_v48 = vpop.eup %2908 }
 0x677   : > { %v2911_v6 = vpop.eup %2910  ;;  %v2027_v11 = vmul.f32 %v2909_v48, %v1968_v4 }
 0x678   : > { %v2029_v26 = vmul.f32 %v2911_v6, %v1969_v8 }
 0x67a   : > { %v2913_v24 = vpop.eup %2912 }
 0x67b   : > { %v2915_v3 = vpop.eup %2914  ;;  %v2031_v25 = vmul.f32 %v2913_v24, %v1970_v0 }
 0x67c   : > { %v2033_v54 = vmul.f32 %v2915_v3, %v1971_v1 }
 0x67e   : > { %v2917_v41 = vpop.eup %2916 }
 0x67f   : > { %v2035_v19 = vmul.f32 %v2917_v41, %v1972_v18  ;;  %v2919_v58 = vpop.eup %2918 }
 0x680   : > { %v2037_v40 = vmul.f32 %v2919_v58, %v1973_v59 }
 0x6d8   : > { %v2121_v57 = vpop.permute.xlu0 %2120 }
 0x6d9   : > { %v2145_v23 = vsel %vm2144_vm3, %v2023_v12, %v2121_v57 }
 0x6da   : > { %2153 = vst [vmem:[%s3385_s16] sm:$0xff] %v2145_v23 }
 0x6db   : > { %v2123_v2 = vpop.permute.xlu1 %2122 }
 0x6dc   : > { %v2125_v9 = vpop.permute.xlu0 %2124  ;;  %v2146_v27 = vsel %vm2144_vm3, %v2025_v37, %v2123_v2 }
 0x6dd   : > { %v2147_v32 = vsel %vm2144_vm3, %v2027_v11, %v2125_v9  ;;  %2154 = vst [vmem:[%s3385_s16 + $0x8] sm:$0xff] %v2146_v27 }
 0x6de   : > { %2155 = vst [vmem:[%s3385_s16 + $0x10] sm:$0xff] %v2147_v32 }
 0x6df   : > { %v2127_v30 = vpop.permute.xlu1 %2126 }
 0x6e0   : > { %v2129_v43 = vpop.permute.xlu0 %2128  ;;  %v2148_v47 = vsel %vm2144_vm3, %v2029_v26, %v2127_v30 }
 0x6e1   : > { %v2149_v39 = vsel %vm2144_vm3, %v2031_v25, %v2129_v43  ;;  %2156 = vst [vmem:[%s3385_s16 + $0x18] sm:$0xff] %v2148_v47 }
 0x6e2   : > { %2157 = vst [vmem:[%s3385_s16 + $0x20] sm:$0xff] %v2149_v39 }
 0x6e3   : > { %v2131_v29 = vpop.permute.xlu1 %2130 }
 0x6e4   : > { %v2133_v10 = vpop.permute.xlu0 %2132  ;;  %v2150_v7 = vsel %vm2144_vm3, %v2033_v54, %v2131_v29 }
 0x6e5   : > { %v2151_v5 = vsel %vm2144_vm3, %v2035_v19, %v2133_v10  ;;  %2158 = vst [vmem:[%s3385_s16 + $0x28] sm:$0xff] %v2150_v7 }
 0x6e6   : > { %2159 = vst [vmem:[%s3385_s16 + $0x30] sm:$0xff] %v2151_v5 }
 0x6e7   : > { %v2135_v51 = vpop.permute.xlu1 %2134 }
 0x6e8   : > { %v2152_v50 = vsel %vm2144_vm3, %v2037_v40, %v2135_v51 }
 0x6e9   : > { %2160 = vst [vmem:[%s3385_s16 + $0x38] sm:$0xff] %v2152_v50 }
 0x6ea PF: > { %s4461_s15 = sld [smem:[#allocation17_spill]]  ;;  %s4462_s18 = sld [smem:[#allocation18_spill]] }
 0x6eb   : > { %s2177_s22 = sshll.u32 %s3385_s16, 4  ;;  %s4463_s0 = sld [smem:[#allocation24_spill]]  ;;  %s4218_s22 = int_to_ptr.vmem [resolvable:$true] %s2177_s22 }
 0x6ec   : > { %s2162_s29 = scalar_lea.sflag [#allocation12], %s3373_s20  ;;  %s2944_s8 = scalar_lea.vmem %s4218_s22, 1024 }
 0x6ed   : > { %p2945_p7 = scmp.ne.s32.totalorder %s4218_s22, %s2944_s8  ;;  %s3098_s11 = smov [#allocation11]  }
 0x6ee   : > { %s2948_s16 = sshll.u32 %s3098_s11, 4  ;;  %s2949_s16 = int_to_ptr.vmem [resolvable:$false] %s2948_s16 }
 0x6ef   : > { %p2946_p8 = pnand %p2945_p7, %p3276_p10  ;;  %p2951_p13 = scmp.lt.s32.totalorder %s4218_s22, %s2949_s16 }
 0x6f0   : > { %s2427_s27 = sshll.u32 %s4461_s15, 3  ;;  %s2428_s19 = sshll.u32 %s4462_s18, 5 }
 0x6f1   : > { %s2174_s25 = sadd.s32 %s2428_s19, %s2427_s27  ;;  %p2947_p9 = pneg %p2946_p8 }
 0x6f2   : > { %s2429_s26 = sshll.u32 %s2174_s25, 7  ;;  %s2950_s15 = scalar_lea.vmem %s2949_s16, 2048 }
 0x6f3   : > { %s4223_s10 = scalar_lea.hbm %s4463_s0, %s2429_s26  ;;  %p2952_p1 = scmp.lt.s32.totalorder %s2950_s15, %s2944_s8 }
 0x6f5   : > { %p2953_p2 = por %p2952_p1, %p2951_p13 }
 0x6f7   : > { %p2954_p11 = pnand %p2953_p2, %p2947_p9 }
 0x6f9   : > { %2957 = shalt.err (!%p2954_p11)
}
 0x6fa   : > { %s2958_s18 = scalar_lea.hbm %s4223_s10, 1024  ;;  %s2962_s25 = scalar_lea.hbm %s4463_s0, 8192 }
 0x6fb   : > { %p2959_p0 = scmp.ne.s32.totalorder %s4223_s10, %s2958_s18  ;;  %p2963_p5 = scmp.lt.u32.totalorder %s4223_s10, %s4463_s0 }
 0x6fc   : > { %p2964_p6 = scmp.lt.u32.totalorder %s2962_s25, %s2958_s18  ;;  %p2966_p8 = scmp.lt.u32.totalorder %s2958_s18, %s4223_s10 }
 0x6fd   : > { %p2960_p3 = pnand %p2959_p0, %p3276_p10 }
 0x6fe   : > { %p2965_p7 = por %p2964_p6, %p2963_p5 }
 0x6ff   : > { %p2961_p4 = pneg %p2960_p3 }
 0x700   : > { %p2967_p9 = por %p2966_p8, %p2965_p7 }
 0x702   : > { %p2968_p13 = pnand %p2967_p9, %p2961_p4 }
 0x704   : > { %2971 = shalt.err (!%p2968_p13)
}
 0x705   : > { %s3099_s23 = smov 128   ;;  %s3100_s8 = smov 8  }
 0x706   : > { %2691 = dma.vmem_to_hbm [thread:$0]  (%p3276_p10), %s4218_s22, 1024, %s4223_s10, %s2162_s29, %s3099_s23, %s3099_s23, %s3100_s8  }
 0x707 PF: > { %p2697_p1 = scmp.ge.s32.totalorder %s3088_s14, 2  ;;  %s2192_s11 = sand.u32 1, %s3036_s1  }
 0x708   : > { %s2193_s16 = scalar_lea.sflag [#allocation12], %s2192_s11 }
 0x709   : > { %p2694_p2 = pnand %p2697_p1, %p3287_p12 }
 0x70b   : > { %3031 = dma.done.wait (!%p2694_p2), %s2193_s16, 1024  }
 0x70c   : > { %3033 = vsyncadd (!%p2694_p2), %s2193_s16, 4294966272  ;;  %s28_s14 = sadd.s32 1, %s3088_s14   ;;  %s4465_s8 = sld [smem:[#allocation19_spill]] }
 0x70d   : > { %p4254_p11 = scmp.ge.s32.totalorder %s28_s14, 34   ;;  %s4466_s11 = sld [smem:[#allocation20_spill]] }
 0x70e   : > { %s4467_s5 = sld [smem:[#allocation21_spill]]  ;;  %s4468_s24 = sld [smem:[#allocation22_spill]] }
 0x70f   : > { %s4469_s1 = smov %s3056_s6  ;;  %s4470_s27 = smov %s3044_s28 }
 0x710   : > { %s4471_s28 = smov %s3285_s17  ;;  %s4472_s29 = smov %s3052_s30 }
 0x711   : > { %s4473_s30 = smov %s3271_s4  ;;  %s4474_s6 = smov %s3060_s7 }
 0x712   : > { %s4475_s7 = smov %s3260_s9  ;;  %s4476_s9 = smov %s3080_s12 }
 0x713   : > { %s4477_s10 = smov %s3084_s13  ;;  %27 = sbr.rel (!%p4254_p11) target bundleno = 34 (0x22), region = 222 }
 0x714   : > { %s4478_s12 = smov %s4467_s5  ;;  %s4479_s13 = smov %s4468_s24 }
 0x71a   :  { %2198 = vsyncpa [#allocation12], 1 }
 0x71b   :  { %2200 = vsyncpa [#allocation12 + $0x1], 1 }

</bundles_post_ra>
